<compile_context>
chip_gen: v7x
topology: tpu7x:2x2x1
jax: 0.10.0
libtpu: 0.0.40
codegen_flags: <defaults>
</compile_context>

<pallas_src>
import functools

import jax
import jax.numpy as jnp
from jax.experimental import pallas as pl
from jax.experimental.pallas import tpu as pltpu


def _round_up(x, m):
    return (x + m - 1) // m * m


# --------------------- conv GEMM kernel:  relu(W @ X + b) ----------------------
# W: (Cout, K) bf16 (BN scale folded in), X: (K, TM) bf16 patches, b: (Cout, 1) f32.
# Full K in one dot (K <= 800), grid only over lane-dense M tiles -> no accumulator.

def _conv_gemm_kernel(w_ref, x_ref, b_ref, o_ref):
    acc = jnp.dot(w_ref[...], x_ref[...], preferred_element_type=jnp.float32)
    o_ref[...] = jnp.maximum(acc + b_ref[...], 0.0).astype(o_ref.dtype)


def conv_gemm(w, pt, b, out_dtype=jnp.bfloat16):
    """relu(w @ pt + b): w (Cout, Kc), pt (K, M) with K <= Kc, b (Cout, 1)."""
    Cout, Kc = w.shape
    K, M = pt.shape
    TM = min(2048, _round_up(M, 128))          # big lane tile (perf review: large TM)
    Mp = _round_up(M, TM)
    xp = jnp.pad(pt, ((0, Kc - K), (0, Mp - M)))

    out = pl.pallas_call(
        _conv_gemm_kernel,
        out_shape=jax.ShapeDtypeStruct((Cout, Mp), out_dtype),
        grid_spec=pltpu.PrefetchScalarGridSpec(
            num_scalar_prefetch=0,
            grid=(Mp // TM,),
            in_specs=[
                pl.BlockSpec((Cout, Kc), lambda i: (0, 0)),   # weights resident
                pl.BlockSpec((Kc, TM), lambda i: (0, i)),     # stream patches
                pl.BlockSpec((Cout, 1), lambda i: (0, 0)),    # folded bias
            ],
            out_specs=pl.BlockSpec((Cout, TM), lambda i: (0, i)),
        ),
        compiler_params=pltpu.CompilerParams(
            dimension_semantics=("parallel",)),
    )(w, xp, b)
    return out[:, :M]


def conv_bn_relu(x_cnhw, w_folded, b_folded, kernel_size=5, stride=2):
    """Conv2d(k=5, s=2) + BatchNorm(eval, folded) + ReLU in C-major (C, N, H, W) layout."""
    Cin, B, H, W = x_cnhw.shape
    OH = (H - kernel_size) // stride + 1
    OW = (W - kernel_size) // stride + 1
    K = kernel_size * kernel_size * Cin
    # TODO(synk): fuse this strided patch extraction into the Pallas kernel.
    taps = []
    for kh in range(kernel_size):
        for kw in range(kernel_size):
            taps.append(x_cnhw[:, :, kh:kh + stride * OH:stride,
                               kw:kw + stride * OW:stride])
    # (25, Cin, B, OH, OW) -> (K, M); K order (kh, kw, cin) matches the folded weight.
    pt = jnp.stack(taps, axis=0).reshape(K, B * OH * OW)
    y = conv_gemm(w_folded, pt, b_folded)                 # (Cout, M)
    Cout = w_folded.shape[0]
    return y.reshape(Cout, B, OH, OW)


# ------------------- fused dual-SiLU head:  silu(flat @ Whead + b) --------------
# M = batch (tiny, padded to 8), N = 2*features (padded to 128), K large.
# Grid only over K with a big TK (full K up to 4096, else 4096) -> few grid steps.

def _head_silu_kernel(x_ref, w_ref, b_ref, o_ref, acc_ref):
    @pl.when(pl.program_id(0) == 0)
    def _init():
        acc_ref[...] = jnp.zeros_like(acc_ref)

    acc_ref[...] += jnp.dot(x_ref[...], w_ref[...],
                            preferred_element_type=jnp.float32)

    @pl.when(pl.program_id(0) == pl.num_programs(0) - 1)
    def _finalize():
        y = acc_ref[...] + b_ref[...]
        o_ref[...] = y * (1.0 / (1.0 + jnp.exp(-y)))      # exact SiLU (f32 epilogue)


def _head_tiles(k):
    k_pad = _round_up(k, 128)
    if k_pad <= 4096:
        return k_pad, k_pad
    return 4096, _round_up(k, 4096)


def head_silu(flat, w_head_p, b_head_p):
    B, K = flat.shape
    Kp, NH = w_head_p.shape
    TK, Kp2 = _head_tiles(K)
    assert Kp == Kp2, "head weight padding mismatch"
    Bp = _round_up(B, 8)
    xp = jnp.pad(flat.astype(jnp.bfloat16), ((0, Bp - B), (0, Kp - K)))

    return pl.pallas_call(
        _head_silu_kernel,
        out_shape=jax.ShapeDtypeStruct((Bp, NH), jnp.float32),
        grid_spec=pltpu.PrefetchScalarGridSpec(
            num_scalar_prefetch=0,
            grid=(Kp // TK,),
            in_specs=[
                pl.BlockSpec((Bp, TK), lambda k: (0, k)),
                pl.BlockSpec((TK, NH), lambda k: (k, 0)),
                pl.BlockSpec((1, NH), lambda k: (0, 0)),
            ],
            out_specs=pl.BlockSpec((Bp, NH), lambda k: (0, 0)),
            scratch_shapes=[pltpu.VMEM((Bp, NH), jnp.float32)],
        ),
        compiler_params=pltpu.CompilerParams(
            dimension_semantics=("arbitrary",)),
    )(xp, w_head_p, b_head_p)


# --------------- fused tail: hidden Linear -> dropout -> relu(q Linear) ---------
# All operands are single lane-dense tiles (128-wide); dropout mask is precomputed
# outside (pltpu PRNG has no interpret-mode lowering) and multiplied in-kernel.

def _tail_kernel(h_ref, wh_ref, bh_ref, mask_ref, wq_ref, bq_ref, q_ref):
    hidden = jnp.dot(h_ref[...], wh_ref[...],
                     preferred_element_type=jnp.float32) + bh_ref[...]
    hidden = hidden * mask_ref[...]                      # dropout (keep=0.25, x4)
    q = jnp.dot(hidden, wq_ref[...],
                preferred_element_type=jnp.float32) + bq_ref[...]
    q_ref[...] = jnp.maximum(q, 0.0)


def tail_q(head_p, wh_p, bh_p, mask, wq_p, bq_p):
    Bp = head_p.shape[0]
    AQ = wq_p.shape[1]
    vmem = pl.BlockSpec(memory_space=pltpu.MemorySpace.VMEM)
    return pl.pallas_call(
        _tail_kernel,
        out_shape=jax.ShapeDtypeStruct((Bp, AQ), jnp.float32),
        in_specs=[vmem] * 6,
        out_specs=vmem,
    )(head_p, wh_p, bh_p, mask, wq_p, bq_p)


# -------------------- one-time weight preprocessing (outside jit) ---------------

def preprocess_params(params, eps=1e-5):
    prep = {}
    for name in ("conv1", "conv2", "conv3"):
        p = params[name]
        cout, cin, k, _ = p["w"].shape
        s = p["gamma"] / jnp.sqrt(p["var"] + eps)              # BN scale
        w2 = jnp.transpose(p["w"], (0, 2, 3, 1)).reshape(cout, k * k * cin)
        w2 = w2 * s[:, None]                                   # fold BN into W
        b = s * (p["b"] - p["mean"]) + p["beta"]                # folded bias
        K = k * k * cin
        Kc = _round_up(K, 16)                                   # bf16 sublane align
        prep[name] = {
            "w": jnp.pad(w2.astype(jnp.bfloat16), ((0, 0), (0, Kc - K))),
            "b": b.astype(jnp.float32).reshape(cout, 1),
        }

    # Fused dual-SiLU head: pre-concat hidden_q|hidden_v, pre-cast, pre-pad to (Kp, NH).
    wq_h, wv_h = params["hidden_q"]["w"], params["hidden_v"]["w"]
    K, F = wq_h.shape
    NH = _round_up(2 * F, 128)
    _, Kp = _head_tiles(K)
    w_head = jnp.concatenate([wq_h, wv_h], axis=1)
    b_head = jnp.concatenate([params["hidden_q"]["b"], params["hidden_v"]["b"]])
    prep["head"] = {
        "w": jnp.pad(w_head.astype(jnp.bfloat16), ((0, Kp - K), (0, NH - 2 * F))),
        "b": jnp.pad(b_head.astype(jnp.float32), (0, NH - 2 * F)).reshape(1, NH),
    }

    # Tail: pad hidden width and action width to 128 lanes (lane-dense), keep f32.
    wh, bh = params["hidden"]["w"], params["hidden"]["b"]        # (2F, F), (F,)
    wq, bq = params["q"]["w"], params["q"]["b"]                  # (F, A), (A,)
    F2, Fh = wh.shape
    A = wq.shape[1]
    FH = _round_up(Fh, 128)
    AQ = _round_up(A, 128)
    prep["tail"] = {
        "wh": jnp.pad(wh.astype(jnp.float32), ((0, NH - F2), (0, FH - Fh))),
        "bh": jnp.pad(bh.astype(jnp.float32), (0, FH - Fh)).reshape(1, FH),
        "wq": jnp.pad(wq.astype(jnp.float32), ((0, FH - Fh), (0, AQ - A))),
        "bq": jnp.pad(bq.astype(jnp.float32), (0, AQ - A)).reshape(1, AQ),
    }
    return prep


# ------------------------------------ forward -----------------------------------

def single_q_forward(prep, x_nchw, dropout_key, *, features_n=64, actions_n=5):
    # NCHW -> C-major (C, N, H, W) trunk layout; bf16 activations throughout.
    x = jnp.transpose(x_nchw, (1, 0, 2, 3)).astype(jnp.bfloat16)
    for name in ("conv1", "conv2", "conv3"):
        x = conv_bn_relu(x, prep[name]["w"], prep[name]["b"])

    Cout, B, OH, OW = x.shape
    # Match PyTorch's .view(N, -1) on an NCHW tensor: per-sample (c, h, w) order.
    flat = jnp.transpose(x, (1, 0, 2, 3)).reshape(B, Cout * OH * OW)

    # Fused dual SiLU head: output is directly [hq | hv] (torch.cat([hq, hv], dim=1)).
    head = head_silu(flat, prep["head"]["w"], prep["head"]["b"])     # (Bp, NH) f32
    hq = head[:B, :features_n]
    hv = head[:B, features_n:2 * features_n]

    # F.dropout(p=0.75, training=True): keep prob 0.25, survivors scaled by 4.
    Bp = head.shape[0]
    FH = prep["tail"]["wh"].shape[1]
    mask = jax.random.bernoulli(dropout_key, 0.25, (Bp, FH)).astype(jnp.float32) * 4.0

    q = tail_q(head, prep["tail"]["wh"], prep["tail"]["bh"], mask,
               prep["tail"]["wq"], prep["tail"]["bq"])
    return q[:B, :actions_n], hq, hv


# ------------------------------------ params ------------------------------------

def conv2d_size_out(size, kernel_size=5, stride=2):
    return (size - (kernel_size - 1) - 1) // stride + 1


def init_params(key, w=64, h=64, actions_n=5, features_n=64):
    conv_w = conv2d_size_out(conv2d_size_out(conv2d_size_out(w)))
    conv_h = conv2d_size_out(conv2d_size_out(conv2d_size_out(h)))
    linear_input_size = conv_h * conv_w * 32

    ks = jax.random.split(key, 16)

    def conv_block(kw, kb, cin, cout):
        return {
            "w": (jax.random.normal(kw, (cout, cin, 5, 5)) * 0.05).astype(jnp.float32),
            "b": (jax.random.normal(kb, (cout,)) * 0.05).astype(jnp.float32),
            "gamma": jnp.ones((cout,), jnp.float32),
            "beta": jnp.zeros((cout,), jnp.float32),
            "mean": jnp.zeros((cout,), jnp.float32),
            "var": jnp.ones((cout,), jnp.float32),
        }

    def linear(kw, kb, din, dout):
        return {
            "w": (jax.random.normal(kw, (din, dout)) * 0.05).astype(jnp.float32),
            "b": (jax.random.normal(kb, (dout,)) * 0.05).astype(jnp.float32),
        }

    return {
        "conv1": conv_block(ks[0], ks[1], 3, 16),
        "conv2": conv_block(ks[2], ks[3], 16, 32),
        "conv3": conv_block(ks[4], ks[5], 32, 32),
        "hidden_v": linear(ks[6], ks[7], linear_input_size, features_n),
        "hidden_q": linear(ks[8], ks[9], linear_input_size, features_n),
        "hidden": linear(ks[10], ks[11], features_n * 2, features_n),
        "q": linear(ks[12], ks[13], features_n, actions_n),
    }


# ------------------------------------- main --------------------------------------

if __name__ == "__main__":
    key = jax.random.PRNGKey(0)
    k_x, k_params, k_drop = jax.random.split(key, 3)

    B, C, H, W = 2, 3, 64, 64           # small demo shapes; module defaults are 512x512
    x = jax.random.normal(k_x, (B, C, H, W), dtype=jnp.float32)

    params = init_params(k_params, w=W, h=H, actions_n=5, features_n=64)
    prep = preprocess_params(params)    # one-time weight prep, hoisted out of the jit

    fwd = jax.jit(functools.partial(single_q_forward, features_n=64, actions_n=5))
    q, hq, hv = fwd(prep, x, k_drop)
    jax.block_until_ready((q, hq, hv))

    assert q.shape == (B, 5) and hq.shape == (B, 64) and hv.shape == (B, 64)
    assert bool(jnp.all(jnp.isfinite(q)))
    assert bool(jnp.all(jnp.isfinite(hq))) and bool(jnp.all(jnp.isfinite(hv)))
    assert bool(jnp.all(q >= 0.0))      # reference applies F.relu to the q head
    print("KERNEL_OK")
</pallas_src>

<mosaic_0001>
module attributes {stable_mosaic.version = 11 : i64} {
  func.func @_conv_gemm_kernel(%arg0: i32, %arg1: memref<16x80xbf16, #tpu.memory_space<vmem>>, %arg2: memref<80x1920xbf16, #tpu.memory_space<vmem>>, %arg3: memref<16x1xf32, #tpu.memory_space<vmem>>, %arg4: memref<16x1920xbf16, #tpu.memory_space<vmem>>) attributes {dimension_semantics = [#tpu.dimension_semantics<parallel>], iteration_bounds = array<i64: 1>, scalar_prefetch = 0 : i64, scratch_operands = 0 : i64, tpu.core_type = #tpu.core_type<tc>, window_params = [{pipeline_mode = #tpu.pipeline_mode<synchronous>, transform_indices = @transform_0, window_bounds = array<i64: 16, 80>}, {transform_indices = @transform_1, window_bounds = array<i64: 80, 1920>}, {pipeline_mode = #tpu.pipeline_mode<synchronous>, transform_indices = @transform_2, window_bounds = array<i64: 16, 1>}, {transform_indices = @transform_3, window_bounds = array<i64: 16, 1920>}]} {
    %c0 = arith.constant 0 : index
    %c0_0 = arith.constant 0 : index
    %0 = vector.load %arg1[%c0, %c0_0] : memref<16x80xbf16, #tpu.memory_space<vmem>>, vector<16x80xbf16>
    %c0_1 = arith.constant 0 : index
    %c0_2 = arith.constant 0 : index
    %1 = vector.load %arg2[%c0_1, %c0_2] : memref<80x1920xbf16, #tpu.memory_space<vmem>>, vector<80x1920xbf16>
    %cst = arith.constant dense<0.000000e+00> : vector<16x1920xf32>
    %2 = tpu.matmul %0, %1, %cst {dimension_numbers = #tpu.dot_dimension_numbers<[1], [0], [0], [1], [0, 0, 1, 1], [], []>} : vector<16x80xbf16>, vector<80x1920xbf16>, vector<16x1920xf32> -> vector<16x1920xf32>
    %c0_3 = arith.constant 0 : index
    %c0_4 = arith.constant 0 : index
    %3 = vector.load %arg3[%c0_3, %c0_4] : memref<16x1xf32, #tpu.memory_space<vmem>>, vector<16x1xf32>
    %4 = vector.broadcast %3 : vector<16x1xf32> to vector<16x1920xf32>
    %5 = arith.addf %2, %4 : vector<16x1920xf32>
    %cst_5 = arith.constant 0.000000e+00 : f32
    %6 = vector.broadcast %cst_5 : f32 to vector<16x1920xf32>
    %7 = arith.maximumf %5, %6 : vector<16x1920xf32>
    %8 = arith.truncf %7 : vector<16x1920xf32> to vector<16x1920xbf16>
    %c0_6 = arith.constant 0 : index
    %c0_7 = arith.constant 0 : index
    %9 = vector.load %arg4[%c0_6, %c0_7] : memref<16x1920xbf16, #tpu.memory_space<vmem>>, vector<16x1920xbf16>
    tpu.vector_store %arg4[%c0_6, %c0_7], %8 {strides = array<i32>} : memref<16x1920xbf16, #tpu.memory_space<vmem>>, vector<16x1920xbf16>,
    return
  }
  func.func @transform_0(%arg0: i32) -> (i32, i32) {
    %c0_i32 = arith.constant 0 : i32
    %c0_i32_0 = arith.constant 0 : i32
    %c0_i32_1 = arith.constant 0 : i32
    return %c0_i32, %c0_i32_0 : i32, i32
  }
  func.func @transform_1(%arg0: i32) -> (i32, i32) {
    %c0_i32 = arith.constant 0 : i32
    %c0_i32_0 = arith.constant 0 : i32
    return %c0_i32, %arg0 : i32, i32
  }
  func.func @transform_2(%arg0: i32) -> (i32, i32) {
    %c0_i32 = arith.constant 0 : i32
    %c0_i32_0 = arith.constant 0 : i32
    %c0_i32_1 = arith.constant 0 : i32
    return %c0_i32, %c0_i32_0 : i32, i32
  }
  func.func @transform_3(%arg0: i32) -> (i32, i32) {
    %c0_i32 = arith.constant 0 : i32
    %c0_i32_0 = arith.constant 0 : i32
    return %c0_i32, %arg0 : i32, i32
  }
}

module attributes {stable_mosaic.version = 11 : i64} {
  func.func @_conv_gemm_kernel(%arg0: i32, %arg1: memref<32x400xbf16, #tpu.memory_space<vmem>>, %arg2: memref<400x384xbf16, #tpu.memory_space<vmem>>, %arg3: memref<32x1xf32, #tpu.memory_space<vmem>>, %arg4: memref<32x384xbf16, #tpu.memory_space<vmem>>) attributes {dimension_semantics = [#tpu.dimension_semantics<parallel>], iteration_bounds = array<i64: 1>, scalar_prefetch = 0 : i64, scratch_operands = 0 : i64, tpu.core_type = #tpu.core_type<tc>, window_params = [{pipeline_mode = #tpu.pipeline_mode<synchronous>, transform_indices = @transform_0, window_bounds = array<i64: 32, 400>}, {transform_indices = @transform_1, window_bounds = array<i64: 400, 384>}, {pipeline_mode = #tpu.pipeline_mode<synchronous>, transform_indices = @transform_2, window_bounds = array<i64: 32, 1>}, {transform_indices = @transform_3, window_bounds = array<i64: 32, 384>}]} {
    %c0 = arith.constant 0 : index
    %c0_0 = arith.constant 0 : index
    %0 = vector.load %arg1[%c0, %c0_0] : memref<32x400xbf16, #tpu.memory_space<vmem>>, vector<32x400xbf16>
    %c0_1 = arith.constant 0 : index
    %c0_2 = arith.constant 0 : index
    %1 = vector.load %arg2[%c0_1, %c0_2] : memref<400x384xbf16, #tpu.memory_space<vmem>>, vector<400x384xbf16>
    %cst = arith.constant dense<0.000000e+00> : vector<32x384xf32>
    %2 = tpu.matmul %0, %1, %cst {dimension_numbers = #tpu.dot_dimension_numbers<[1], [0], [0], [1], [0, 0, 1, 1], [], []>} : vector<32x400xbf16>, vector<400x384xbf16>, vector<32x384xf32> -> vector<32x384xf32>
    %c0_3 = arith.constant 0 : index
    %c0_4 = arith.constant 0 : index
    %3 = vector.load %arg3[%c0_3, %c0_4] : memref<32x1xf32, #tpu.memory_space<vmem>>, vector<32x1xf32>
    %4 = vector.broadcast %3 : vector<32x1xf32> to vector<32x384xf32>
    %5 = arith.addf %2, %4 : vector<32x384xf32>
    %cst_5 = arith.constant 0.000000e+00 : f32
    %6 = vector.broadcast %cst_5 : f32 to vector<32x384xf32>
    %7 = arith.maximumf %5, %6 : vector<32x384xf32>
    %8 = arith.truncf %7 : vector<32x384xf32> to vector<32x384xbf16>
    %c0_6 = arith.constant 0 : index
    %c0_7 = arith.constant 0 : index
    %9 = vector.load %arg4[%c0_6, %c0_7] : memref<32x384xbf16, #tpu.memory_space<vmem>>, vector<32x384xbf16>
    tpu.vector_store %arg4[%c0_6, %c0_7], %8 {strides = array<i32>} : memref<32x384xbf16, #tpu.memory_space<vmem>>, vector<32x384xbf16>,
    return
  }
  func.func @transform_0(%arg0: i32) -> (i32, i32) {
    %c0_i32 = arith.constant 0 : i32
    %c0_i32_0 = arith.constant 0 : i32
    %c0_i32_1 = arith.constant 0 : i32
    return %c0_i32, %c0_i32_0 : i32, i32
  }
  func.func @transform_1(%arg0: i32) -> (i32, i32) {
    %c0_i32 = arith.constant 0 : i32
    %c0_i32_0 = arith.constant 0 : i32
    return %c0_i32, %arg0 : i32, i32
  }
  func.func @transform_2(%arg0: i32) -> (i32, i32) {
    %c0_i32 = arith.constant 0 : i32
    %c0_i32_0 = arith.constant 0 : i32
    %c0_i32_1 = arith.constant 0 : i32
    return %c0_i32, %c0_i32_0 : i32, i32
  }
  func.func @transform_3(%arg0: i32) -> (i32, i32) {
    %c0_i32 = arith.constant 0 : i32
    %c0_i32_0 = arith.constant 0 : i32
    return %c0_i32, %arg0 : i32, i32
  }
}

module attributes {stable_mosaic.version = 11 : i64} {
  func.func @_conv_gemm_kernel(%arg0: i32, %arg1: memref<32x800xbf16, #tpu.memory_space<vmem>>, %arg2: memref<800x128xbf16, #tpu.memory_space<vmem>>, %arg3: memref<32x1xf32, #tpu.memory_space<vmem>>, %arg4: memref<32x128xbf16, #tpu.memory_space<vmem>>) attributes {dimension_semantics = [#tpu.dimension_semantics<parallel>], iteration_bounds = array<i64: 1>, scalar_prefetch = 0 : i64, scratch_operands = 0 : i64, tpu.core_type = #tpu.core_type<tc>, window_params = [{pipeline_mode = #tpu.pipeline_mode<synchronous>, transform_indices = @transform_0, window_bounds = array<i64: 32, 800>}, {transform_indices = @transform_1, window_bounds = array<i64: 800, 128>}, {pipeline_mode = #tpu.pipeline_mode<synchronous>, transform_indices = @transform_2, window_bounds = array<i64: 32, 1>}, {transform_indices = @transform_3, window_bounds = array<i64: 32, 128>}]} {
    %c0 = arith.constant 0 : index
    %c0_0 = arith.constant 0 : index
    %0 = vector.load %arg1[%c0, %c0_0] : memref<32x800xbf16, #tpu.memory_space<vmem>>, vector<32x800xbf16>
    %c0_1 = arith.constant 0 : index
    %c0_2 = arith.constant 0 : index
    %1 = vector.load %arg2[%c0_1, %c0_2] : memref<800x128xbf16, #tpu.memory_space<vmem>>, vector<800x128xbf16>
    %cst = arith.constant dense<0.000000e+00> : vector<32x128xf32>
    %2 = tpu.matmul %0, %1, %cst {dimension_numbers = #tpu.dot_dimension_numbers<[1], [0], [0], [1], [0, 0, 1, 1], [], []>} : vector<32x800xbf16>, vector<800x128xbf16>, vector<32x128xf32> -> vector<32x128xf32>
    %c0_3 = arith.constant 0 : index
    %c0_4 = arith.constant 0 : index
    %3 = vector.load %arg3[%c0_3, %c0_4] : memref<32x1xf32, #tpu.memory_space<vmem>>, vector<32x1xf32>
    %4 = vector.broadcast %3 : vector<32x1xf32> to vector<32x128xf32>
    %5 = arith.addf %2, %4 : vector<32x128xf32>
    %cst_5 = arith.constant 0.000000e+00 : f32
    %6 = vector.broadcast %cst_5 : f32 to vector<32x128xf32>
    %7 = arith.maximumf %5, %6 : vector<32x128xf32>
    %8 = arith.truncf %7 : vector<32x128xf32> to vector<32x128xbf16>
    %c0_6 = arith.constant 0 : index
    %c0_7 = arith.constant 0 : index
    %9 = vector.load %arg4[%c0_6, %c0_7] : memref<32x128xbf16, #tpu.memory_space<vmem>>, vector<32x128xbf16>
    tpu.vector_store %arg4[%c0_6, %c0_7], %8 {strides = array<i32>} : memref<32x128xbf16, #tpu.memory_space<vmem>>, vector<32x128xbf16>,
    return
  }
  func.func @transform_0(%arg0: i32) -> (i32, i32) {
    %c0_i32 = arith.constant 0 : i32
    %c0_i32_0 = arith.constant 0 : i32
    %c0_i32_1 = arith.constant 0 : i32
    return %c0_i32, %c0_i32_0 : i32, i32
  }
  func.func @transform_1(%arg0: i32) -> (i32, i32) {
    %c0_i32 = arith.constant 0 : i32
    %c0_i32_0 = arith.constant 0 : i32
    return %c0_i32, %arg0 : i32, i32
  }
  func.func @transform_2(%arg0: i32) -> (i32, i32) {
    %c0_i32 = arith.constant 0 : i32
    %c0_i32_0 = arith.constant 0 : i32
    %c0_i32_1 = arith.constant 0 : i32
    return %c0_i32, %c0_i32_0 : i32, i32
  }
  func.func @transform_3(%arg0: i32) -> (i32, i32) {
    %c0_i32 = arith.constant 0 : i32
    %c0_i32_0 = arith.constant 0 : i32
    return %c0_i32, %arg0 : i32, i32
  }
}

module attributes {stable_mosaic.version = 11 : i64} {
  func.func @_head_silu_kernel(%arg0: i32, %arg1: memref<8x896xbf16, #tpu.memory_space<vmem>>, %arg2: memref<896x128xbf16, #tpu.memory_space<vmem>>, %arg3: memref<1x128xf32, #tpu.memory_space<vmem>>, %arg4: memref<8x128xf32, #tpu.memory_space<vmem>>, %arg5: memref<8x128xf32, #tpu.memory_space<vmem>>) attributes {dimension_semantics = [#tpu.dimension_semantics<arbitrary>], iteration_bounds = array<i64: 1>, scalar_prefetch = 0 : i64, scratch_operands = 1 : i64, tpu.core_type = #tpu.core_type<tc>, window_params = [{transform_indices = @transform_0, window_bounds = array<i64: 8, 896>}, {transform_indices = @transform_1, window_bounds = array<i64: 896, 128>}, {pipeline_mode = #tpu.pipeline_mode<synchronous>, transform_indices = @transform_2, window_bounds = array<i64: 1, 128>}, {pipeline_mode = #tpu.pipeline_mode<synchronous>, transform_indices = @transform_3, window_bounds = array<i64: 8, 128>}]} {
    %c0_i32 = arith.constant 0 : i32
    %0 = arith.cmpi eq, %arg0, %c0_i32 : i32
    %1 = arith.extui %0 : i1 to i32
    %c0_i32_0 = arith.constant 0 : i32
    %2 = arith.cmpi ne, %1, %c0_i32_0 : i32
    scf.if %2 {
      %cst_10 = arith.constant 0.000000e+00 : f32
      %12 = vector.broadcast %cst_10 : f32 to vector<8x128xf32>
      %c0_11 = arith.constant 0 : index
      %c0_12 = arith.constant 0 : index
      %13 = vector.load %arg5[%c0_11, %c0_12] : memref<8x128xf32, #tpu.memory_space<vmem>>, vector<8x128xf32>
      tpu.vector_store %arg5[%c0_11, %c0_12], %12 {strides = array<i32>} : memref<8x128xf32, #tpu.memory_space<vmem>>, vector<8x128xf32>,
    } else {
    }
    %c0 = arith.constant 0 : index
    %c0_1 = arith.constant 0 : index
    %3 = vector.load %arg5[%c0, %c0_1] : memref<8x128xf32, #tpu.memory_space<vmem>>, vector<8x128xf32>
    %c0_2 = arith.constant 0 : index
    %c0_3 = arith.constant 0 : index
    %4 = vector.load %arg1[%c0_2, %c0_3] : memref<8x896xbf16, #tpu.memory_space<vmem>>, vector<8x896xbf16>
    %c0_4 = arith.constant 0 : index
    %c0_5 = arith.constant 0 : index
    %5 = vector.load %arg2[%c0_4, %c0_5] : memref<896x128xbf16, #tpu.memory_space<vmem>>, vector<896x128xbf16>
    %cst = arith.constant dense<0.000000e+00> : vector<8x128xf32>
    %6 = tpu.matmul %4, %5, %cst {dimension_numbers = #tpu.dot_dimension_numbers<[1], [0], [0], [1], [0, 0, 1, 1], [], []>} : vector<8x896xbf16>, vector<896x128xbf16>, vector<8x128xf32> -> vector<8x128xf32>
    %7 = arith.addf %3, %6 : vector<8x128xf32>
    %c0_6 = arith.constant 0 : index
    %c0_7 = arith.constant 0 : index
    %8 = vector.load %arg5[%c0_6, %c0_7] : memref<8x128xf32, #tpu.memory_space<vmem>>, vector<8x128xf32>
    tpu.vector_store %arg5[%c0_6, %c0_7], %7 {strides = array<i32>} : memref<8x128xf32, #tpu.memory_space<vmem>>, vector<8x128xf32>,
    %c0_i32_8 = arith.constant 0 : i32
    %9 = arith.cmpi eq, %arg0, %c0_i32_8 : i32
    %10 = arith.extui %9 : i1 to i32
    %c0_i32_9 = arith.constant 0 : i32
    %11 = arith.cmpi ne, %10, %c0_i32_9 : i32
    scf.if %11 {
      %c0_10 = arith.constant 0 : index
      %c0_11 = arith.constant 0 : index
      %12 = vector.load %arg5[%c0_10, %c0_11] : memref<8x128xf32, #tpu.memory_space<vmem>>, vector<8x128xf32>
      %c0_12 = arith.constant 0 : index
      %c0_13 = arith.constant 0 : index
      %13 = vector.load %arg3[%c0_12, %c0_13] : memref<1x128xf32, #tpu.memory_space<vmem>>, vector<1x128xf32>
      %14 = vector.broadcast %13 : vector<1x128xf32> to vector<8x128xf32>
      %15 = arith.addf %12, %14 : vector<8x128xf32>
      %cst_14 = arith.constant 0.000000e+00 : f32
      %16 = vector.broadcast %cst_14 : f32 to vector<8x128xf32>
      %17 = arith.subf %16, %15 : vector<8x128xf32>
      %18 = math.exp %17 : vector<8x128xf32>
      %cst_15 = arith.constant 1.000000e+00 : f32
      %19 = vector.broadcast %cst_15 : f32 to vector<8x128xf32>
      %20 = arith.addf %19, %18 : vector<8x128xf32>
      %cst_16 = arith.constant 1.000000e+00 : f32
      %21 = vector.broadcast %cst_16 : f32 to vector<8x128xf32>
      %22 = arith.divf %21, %20 : vector<8x128xf32>
      %23 = arith.mulf %15, %22 : vector<8x128xf32>
      %c0_17 = arith.constant 0 : index
      %c0_18 = arith.constant 0 : index
      %24 = vector.load %arg4[%c0_17, %c0_18] : memref<8x128xf32, #tpu.memory_space<vmem>>, vector<8x128xf32>
      tpu.vector_store %arg4[%c0_17, %c0_18], %23 {strides = array<i32>} : memref<8x128xf32, #tpu.memory_space<vmem>>, vector<8x128xf32>,
    } else {
    }
    return
  }
  func.func @transform_0(%arg0: i32) -> (i32, i32) {
    %c0_i32 = arith.constant 0 : i32
    %c0_i32_0 = arith.constant 0 : i32
    return %c0_i32, %arg0 : i32, i32
  }
  func.func @transform_1(%arg0: i32) -> (i32, i32) {
    %c0_i32 = arith.constant 0 : i32
    %c0_i32_0 = arith.constant 0 : i32
    return %arg0, %c0_i32 : i32, i32
  }
  func.func @transform_2(%arg0: i32) -> (i32, i32) {
    %c0_i32 = arith.constant 0 : i32
    %c0_i32_0 = arith.constant 0 : i32
    %c0_i32_1 = arith.constant 0 : i32
    return %c0_i32, %c0_i32_0 : i32, i32
  }
  func.func @transform_3(%arg0: i32) -> (i32, i32) {
    %c0_i32 = arith.constant 0 : i32
    %c0_i32_0 = arith.constant 0 : i32
    %c0_i32_1 = arith.constant 0 : i32
    return %c0_i32, %c0_i32_0 : i32, i32
  }
}

module attributes {stable_mosaic.version = 11 : i64} {
  func.func @_tail_kernel(%arg0: memref<8x128xf32, #tpu.memory_space<vmem>>, %arg1: memref<128x128xf32, #tpu.memory_space<vmem>>, %arg2: memref<1x128xf32, #tpu.memory_space<vmem>>, %arg3: memref<8x128xf32, #tpu.memory_space<vmem>>, %arg4: memref<128x128xf32, #tpu.memory_space<vmem>>, %arg5: memref<1x128xf32, #tpu.memory_space<vmem>>, %arg6: memref<8x128xf32, #tpu.memory_space<vmem>>) attributes {dimension_semantics = [], scalar_prefetch = 0 : i64, scratch_operands = 0 : i64, tpu.core_type = #tpu.core_type<tc>} {
    %c0 = arith.constant 0 : index
    %c0_0 = arith.constant 0 : index
    %0 = vector.load %arg0[%c0, %c0_0] : memref<8x128xf32, #tpu.memory_space<vmem>>, vector<8x128xf32>
    %c0_1 = arith.constant 0 : index
    %c0_2 = arith.constant 0 : index
    %1 = vector.load %arg1[%c0_1, %c0_2] : memref<128x128xf32, #tpu.memory_space<vmem>>, vector<128x128xf32>
    %cst = arith.constant dense<0.000000e+00> : vector<8x128xf32>
    %2 = tpu.matmul %0, %1, %cst {dimension_numbers = #tpu.dot_dimension_numbers<[1], [0], [0], [1], [0, 0, 1, 1], [], []>} : vector<8x128xf32>, vector<128x128xf32>, vector<8x128xf32> -> vector<8x128xf32>
    %c0_3 = arith.constant 0 : index
    %c0_4 = arith.constant 0 : index
    %3 = vector.load %arg2[%c0_3, %c0_4] : memref<1x128xf32, #tpu.memory_space<vmem>>, vector<1x128xf32>
    %4 = vector.broadcast %3 : vector<1x128xf32> to vector<8x128xf32>
    %5 = arith.addf %2, %4 : vector<8x128xf32>
    %c0_5 = arith.constant 0 : index
    %c0_6 = arith.constant 0 : index
    %6 = vector.load %arg3[%c0_5, %c0_6] : memref<8x128xf32, #tpu.memory_space<vmem>>, vector<8x128xf32>
    %7 = arith.mulf %5, %6 : vector<8x128xf32>
    %c0_7 = arith.constant 0 : index
    %c0_8 = arith.constant 0 : index
    %8 = vector.load %arg4[%c0_7, %c0_8] : memref<128x128xf32, #tpu.memory_space<vmem>>, vector<128x128xf32>
    %cst_9 = arith.constant dense<0.000000e+00> : vector<8x128xf32>
    %9 = tpu.matmul %7, %8, %cst_9 {dimension_numbers = #tpu.dot_dimension_numbers<[1], [0], [0], [1], [0, 0, 1, 1], [], []>} : vector<8x128xf32>, vector<128x128xf32>, vector<8x128xf32> -> vector<8x128xf32>
    %c0_10 = arith.constant 0 : index
    %c0_11 = arith.constant 0 : index
    %10 = vector.load %arg5[%c0_10, %c0_11] : memref<1x128xf32, #tpu.memory_space<vmem>>, vector<1x128xf32>
    %11 = vector.broadcast %10 : vector<1x128xf32> to vector<8x128xf32>
    %12 = arith.addf %9, %11 : vector<8x128xf32>
    %cst_12 = arith.constant 0.000000e+00 : f32
    %13 = vector.broadcast %cst_12 : f32 to vector<8x128xf32>
    %14 = arith.maximumf %12, %13 : vector<8x128xf32>
    %c0_13 = arith.constant 0 : index
    %c0_14 = arith.constant 0 : index
    %15 = vector.load %arg6[%c0_13, %c0_14] : memref<8x128xf32, #tpu.memory_space<vmem>>, vector<8x128xf32>
    tpu.vector_store %arg6[%c0_13, %c0_14], %14 {strides = array<i32>} : memref<8x128xf32, #tpu.memory_space<vmem>>, vector<8x128xf32>,
    return
  }
}

</mosaic_0001>

<bundles_post_ra>
// kernel: single_q_forward.5
= control target key start
LH: loop header
LB: loop body
LE: loop exit
PB: predicated region body
PF: predicated region fallthrough
CT: control target
= control target key end

     0   :  { %v1233_v1 = vmov 0   ;;  %vm494_vm0 = vcmask 654336   ;;  %vm1235_vm1 = vmmov 0   ;;  %s1598_s1 = inlined_call_operand.vmem [shape: bf16[80,1920], index: 1, kind: input, shape index: {}]   ;;  %s1599_s0 = inlined_call_operand.vmem [shape: bf16[16,80], index: 0, kind: input, shape index: {}]   ;;  %s1600_s2 = inlined_call_operand.vmem [shape: f32[16,1], index: 2, kind: input, shape index: {}]   ;;  %s1601_s3 = inlined_call_operand.vmem [shape: bf16[16,1920], index: 3, kind: output, shape index: {}]  }
   0x1   :  { %v1122_v0 = vld [vmem:[%s1598_s1 + $0x4] ss:$60 sps:$4 sm:$0xff]   ;;  %530 = vmatprep.mubr.bf16.mxu0 %v1233_v1  ;;  %573 = vmatprep.mubr.bf16.mxu1 %v1233_v1  ;;  %v1124_v2 = vld [vmem:[%s1598_s1 + $0xc] ss:$60 sps:$4 sm:$0xff]   ;;  %v1128_v5 = vld [vmem:[%s1598_s1 + $0x7c] ss:$60 sps:$4 sm:$0xff]  }
   0x2   :  { %1121 = vset.pattern.permute.xlu0 %v1233_v1  ;;  %498 = vmatprep.subr.bf16.mxu0 %v1122_v0  ;;  %v1126_v3 = vld [vmem:[%s1598_s1] ss:$60 sps:$4 sm:$0xff]   ;;  %v1127_v4 = vld [vmem:[%s1598_s1 + $0x8] ss:$60 sps:$4 sm:$0xff]   ;;  %v1132_v7 = vld [vmem:[%s1598_s1 + $0x78] ss:$60 sps:$4 sm:$0xff]  }
   0x3   :  { %541 = vmatprep.subr.bf16.mxu1 %v1124_v2  ;;  %499 = vmatpush1.bf16.msra.mxu0 %v1126_v3  ;;  %v1130_v6 = vld [vmem:[%s1598_s1 + $0x84] ss:$60 sps:$4 sm:$0xff]   ;;  %v1134_v9 = vld [vmem:[%s1598_s1 + $0xf4] ss:$60 sps:$4 sm:$0xff]   ;;  %v1136_v10 = vld [vmem:[%s1598_s1 + $0xfc] ss:$60 sps:$4 sm:$0xff]  }
   0x4   :  { %542 = vmatpush1.bf16.msra.mxu1 %v1127_v4  ;;  %500 = vmatprep.subr.bf16.mxu0 %v1128_v5  ;;  %v1133_v8 = vld [vmem:[%s1598_s1 + $0x80] ss:$60 sps:$4 sm:$0xff]   ;;  %v1138_v11 = vld [vmem:[%s1598_s1 + $0xf0] ss:$60 sps:$4 sm:$0xff]   ;;  %v1139_v12 = vld [vmem:[%s1598_s1 + $0xf8] ss:$60 sps:$4 sm:$0xff]  }
   0x5   :  { %543 = vmatprep.subr.bf16.mxu1 %v1130_v6  ;;  %v1140_v13 = vld [vmem:[%s1598_s1 + $0x16c] ss:$60 sps:$4 sm:$0xff]   ;;  %v1142_v14 = vld [vmem:[%s1598_s1 + $0x174] ss:$60 sps:$4 sm:$0xff]   ;;  %v1146_v17 = vld [vmem:[%s1598_s1 + $0x1e4] ss:$60 sps:$4 sm:$0xff]  }
   0x6   :  { %v1144_v15 = vld [vmem:[%s1598_s1 + $0x168] ss:$60 sps:$4 sm:$0xff]   ;;  %v1145_v16 = vld [vmem:[%s1598_s1 + $0x170] ss:$60 sps:$4 sm:$0xff]   ;;  %v1150_v19 = vld [vmem:[%s1598_s1 + $0x1e0] ss:$60 sps:$4 sm:$0xff]  }
   0x7   :  { %501 = vmatpush1.bf16.msra.mxu0 %v1132_v7  ;;  %v1148_v18 = vld [vmem:[%s1598_s1 + $0x1ec] ss:$60 sps:$4 sm:$0xff]   ;;  %v1155_v21 = vld [vmem:[%s1598_s1 + $0x14] ss:$60 sps:$4 sm:$0xff]   ;;  %v1158_v22 = vld [vmem:[%s1598_s1 + $0x1c] ss:$60 sps:$4 sm:$0xff]  }
   0x8   :  { %544 = vmatpush1.bf16.msra.mxu1 %v1133_v8  ;;  %502 = vmatprep.subr.bf16.mxu0 %v1134_v9  ;;  %v1151_v20 = vld [vmem:[%s1598_s1 + $0x1e8] ss:$60 sps:$4 sm:$0xff]   ;;  %v1153_v24 = vld [vmem:[%s1598_s1 + $0x10] ss:$60 sps:$4 sm:$0xff]   ;;  %v1156_v25 = vld [vmem:[%s1598_s1 + $0x18] ss:$60 sps:$4 sm:$0xff]  }
   0x9   :  { %545 = vmatprep.subr.bf16.mxu1 %v1136_v10  ;;  %v1328_v23 = vld [vmem:[%s1599_s0] sm:$0xff]   ;;  %v1161_v26 = vld [vmem:[%s1598_s1 + $0x8c] ss:$60 sps:$4 sm:$0xff]   ;;  %v1164_v27 = vld [vmem:[%s1598_s1 + $0x94] ss:$60 sps:$4 sm:$0xff]   ;;  %v1234_v4 = vmov 0.0  }
   0xa   :  { %v1159_v28 = vld [vmem:[%s1598_s1 + $0x88] ss:$60 sps:$4 sm:$0xff]   ;;  %v1162_v29 = vld [vmem:[%s1598_s1 + $0x90] ss:$60 sps:$4 sm:$0xff]   ;;  %v1165_v32 = vld [vmem:[%s1598_s1 + $0x100] ss:$60 sps:$4 sm:$0xff]  }
   0xb   :  { %503 = vmatpush1.bf16.msra.mxu0 %v1138_v11  ;;  %v1167_v30 = vld [vmem:[%s1598_s1 + $0x104] ss:$60 sps:$4 sm:$0xff]   ;;  %v1170_v31 = vld [vmem:[%s1598_s1 + $0x10c] ss:$60 sps:$4 sm:$0xff]   ;;  %v1173_v34 = vld [vmem:[%s1598_s1 + $0x17c] ss:$60 sps:$4 sm:$0xff]  }
   0xc   :  { %546 = vmatpush1.bf16.msra.mxu1 %v1139_v12  ;;  %504 = vmatprep.subr.bf16.mxu0 %v1140_v13  ;;  %v1168_v33 = vld [vmem:[%s1598_s1 + $0x108] ss:$60 sps:$4 sm:$0xff]   ;;  %v1171_v36 = vld [vmem:[%s1598_s1 + $0x178] ss:$60 sps:$4 sm:$0xff]   ;;  %v1174_v37 = vld [vmem:[%s1598_s1 + $0x180] ss:$60 sps:$4 sm:$0xff]  }
   0xd   :  { %547 = vmatprep.subr.bf16.mxu1 %v1142_v14  ;;  %v1176_v35 = vld [vmem:[%s1598_s1 + $0x184] ss:$60 sps:$4 sm:$0xff]   ;;  %v1179_v38 = vld [vmem:[%s1598_s1 + $0x1f4] ss:$60 sps:$4 sm:$0xff]   ;;  %v1182_v39 = vld [vmem:[%s1598_s1 + $0x1fc] ss:$60 sps:$4 sm:$0xff]  }
   0xe   :  { %v1177_v40 = vld [vmem:[%s1598_s1 + $0x1f0] ss:$60 sps:$4 sm:$0xff]   ;;  %v1180_v41 = vld [vmem:[%s1598_s1 + $0x1f8] ss:$60 sps:$4 sm:$0xff]   ;;  %v1185_v42 = vld [vmem:[%s1598_s1 + $0x24] ss:$60 sps:$4 sm:$0xff]  }
   0xf   :  { %505 = vmatpush1.bf16.msra.mxu0 %v1144_v15  ;;  %v1188_v43 = vld [vmem:[%s1598_s1 + $0x2c] ss:$60 sps:$4 sm:$0xff]   ;;  %v1183_v44 = vld [vmem:[%s1598_s1 + $0x20] ss:$60 sps:$4 sm:$0xff]   ;;  %v1189_v48 = vld [vmem:[%s1598_s1 + $0x98] ss:$60 sps:$4 sm:$0xff]  }
  0x10   :  { %548 = vmatpush1.bf16.msra.mxu1 %v1145_v16  ;;  %506 = vmatprep.subr.bf16.mxu0 %v1146_v17  ;;  %v1186_v45 = vld [vmem:[%s1598_s1 + $0x28] ss:$60 sps:$4 sm:$0xff]   ;;  %v1191_v46 = vld [vmem:[%s1598_s1 + $0x9c] ss:$60 sps:$4 sm:$0xff]   ;;  %v1197_v50 = vld [vmem:[%s1598_s1 + $0x114] ss:$60 sps:$4 sm:$0xff]  }
  0x11   :  { %549 = vmatprep.subr.bf16.mxu1 %v1148_v18  ;;  %v1194_v47 = vld [vmem:[%s1598_s1 + $0xa4] ss:$60 sps:$4 sm:$0xff]   ;;  %v1200_v51 = vld [vmem:[%s1598_s1 + $0x11c] ss:$60 sps:$4 sm:$0xff]   ;;  %v1195_v52 = vld [vmem:[%s1598_s1 + $0x110] ss:$60 sps:$4 sm:$0xff]  }
  0x12   :  { %v1192_v49 = vld [vmem:[%s1598_s1 + $0xa0] ss:$60 sps:$4 sm:$0xff]   ;;  %v1198_v53 = vld [vmem:[%s1598_s1 + $0x118] ss:$60 sps:$4 sm:$0xff]   ;;  %v1203_v54 = vld [vmem:[%s1598_s1 + $0x18c] ss:$60 sps:$4 sm:$0xff]  }
  0x13   :  { %507 = vmatpush1.bf16.msra.mxu0 %v1150_v19  ;;  %v1206_v55 = vld [vmem:[%s1598_s1 + $0x194] ss:$60 sps:$4 sm:$0xff]   ;;  %v1201_v56 = vld [vmem:[%s1598_s1 + $0x188] ss:$60 sps:$4 sm:$0xff]   ;;  %v1207_v62 = vld [vmem:[%s1598_s1 + $0x200] ss:$60 sps:$4 sm:$0xff]  }
  0x14   :  { %550 = vmatpush1.bf16.msra.mxu1 %v1151_v20  ;;  %584 = vmatprep.subr.bf16.mxu0 %v1155_v21  ;;  %v1204_v57 = vld [vmem:[%s1598_s1 + $0x190] ss:$60 sps:$4 sm:$0xff]   ;;  %v97_v58 = vld [vmem:[%s1600_s2] sm:$0xff]  ;;  %v1216_v3 = vld [vmem:[%s1598_s1 + $0x38] ss:$60 sps:$4 sm:$0xff]  }
  0x15   :  { %627 = vmatprep.subr.bf16.mxu1 %v1158_v22  ;;  %v1209_v59 = vld [vmem:[%s1598_s1 + $0x204] ss:$60 sps:$4 sm:$0xff]   ;;  %v1212_v60 = vld [vmem:[%s1598_s1 + $0x20c] ss:$60 sps:$4 sm:$0xff]   ;;  %101 = vperm.xlu0 %1121, %v97_v58   ;;  %v1215_v0 = vld [vmem:[%s1598_s1 + $0x34] ss:$60 sps:$4 sm:$0xff]  }
  0x16   :  { %1058 = vmatmul.mubr.msk.bf16.vlgmr.msra.gmra.mrb[0].mxu0 %vm494_vm0, %v1328_v23  ;;  %v98_v61 = vld [vmem:[%s1600_s2 + $0x8] sm:$0xff]  ;;  %v1223_v8 = vld [vmem:[%s1598_s1 + $0x124] ss:$60 sps:$4 sm:$0xff]   ;;  %v1227_v11 = vld [vmem:[%s1598_s1 + $0x19c] ss:$60 sps:$4 sm:$0xff]  }
  0x17   :  { %1059 = vmatmul.mubr.msk.bf16.vlgmr.msra.gmra.mrb[0].mxu1 %vm494_vm0, %v1328_v23  ;;  %585 = vmatpush1.bf16.msra.mxu0 %v1153_v24  ;;  %v1210_v63 = vld [vmem:[%s1598_s1 + $0x208] ss:$60 sps:$4 sm:$0xff]   ;;  %v1213_v2 = vld [vmem:[%s1598_s1 + $0x30] ss:$60 sps:$4 sm:$0xff]   ;;  %v1221_v9 = vld [vmem:[%s1598_s1 + $0x120] ss:$60 sps:$4 sm:$0xff]  }
  0x18   :  { %628 = vmatpush1.bf16.msra.mxu1 %v1156_v25  ;;  %586 = vmatprep.subr.bf16.mxu0 %v1161_v26  ;;  %v1219_v5 = vld [vmem:[%s1598_s1 + $0xac] ss:$60 sps:$4 sm:$0xff]   ;;  %v1228_v12 = vld [vmem:[%s1598_s1 + $0x1a0] ss:$60 sps:$4 sm:$0xff]   ;;  %v1231_v13 = vld [vmem:[%s1598_s1 + $0x214] ss:$60 sps:$4 sm:$0xff]  }
  0x19   :  { %629 = vmatprep.subr.bf16.mxu1 %v1164_v27  ;;  %616 = vmatprep.mubr.bf16.mxu0 %v1233_v1  ;;  %v1217_v6 = vld [vmem:[%s1598_s1 + $0xa8] ss:$60 sps:$4 sm:$0xff]   ;;  %v1220_v7 = vld [vmem:[%s1598_s1 + $0xb0] ss:$60 sps:$4 sm:$0xff]   ;;  %v1232_v15 = vld [vmem:[%s1598_s1 + $0x218] ss:$60 sps:$4 sm:$0xff]  }
  0x1a   :  { %659 = vmatprep.mubr.bf16.mxu1 %v1233_v1  ;;  %106 = vperm.xlu0 %1121, %v98_v61   ;;  %v1224_v10 = vld [vmem:[%s1598_s1 + $0x128] ss:$60 sps:$4 sm:$0xff]   ;;  %v1229_v14 = vld [vmem:[%s1598_s1 + $0x210] ss:$60 sps:$4 sm:$0xff]  }
  0x1b   :  { %587 = vmatpush1.bf16.msra.mxu0 %v1159_v28 }
  0x1c   :  { %630 = vmatpush1.bf16.msra.mxu1 %v1162_v29  ;;  %588 = vmatprep.subr.bf16.mxu0 %v1167_v30 }
  0x1d   :  { %631 = vmatprep.subr.bf16.mxu1 %v1170_v31 }
  0x1f   :  { %589 = vmatpush1.bf16.msra.mxu0 %v1165_v32 }
  0x20   :  { %632 = vmatpush1.bf16.msra.mxu1 %v1168_v33  ;;  %590 = vmatprep.subr.bf16.mxu0 %v1173_v34 }
  0x21   :  { %633 = vmatprep.subr.bf16.mxu1 %v1176_v35 }
  0x23   :  { %591 = vmatpush1.bf16.msra.mxu0 %v1171_v36 }
  0x24   :  { %634 = vmatpush1.bf16.msra.mxu1 %v1174_v37  ;;  %592 = vmatprep.subr.bf16.mxu0 %v1179_v38 }
  0x25   :  { %635 = vmatprep.subr.bf16.mxu1 %v1182_v39 }
  0x27   :  { %593 = vmatpush1.bf16.msra.mxu0 %v1177_v40 }
  0x28   :  { %636 = vmatpush1.bf16.msra.mxu1 %v1180_v41  ;;  %670 = vmatprep.subr.bf16.mxu0 %v1185_v42 }
  0x29   :  { %713 = vmatprep.subr.bf16.mxu1 %v1188_v43 }
  0x2a   :  { %1060 = vmatmul.mubr.msk.bf16.vlgmr.msra.gmra.mrb[4].mxu0 %vm494_vm0, %v1328_v23 }
  0x2b   :  { %1061 = vmatmul.mubr.msk.bf16.vlgmr.msra.gmra.mrb[4].mxu1 %vm494_vm0, %v1328_v23  ;;  %671 = vmatpush1.bf16.msra.mxu0 %v1183_v44 }
  0x2c   :  { %714 = vmatpush1.bf16.msra.mxu1 %v1186_v45  ;;  %672 = vmatprep.subr.bf16.mxu0 %v1191_v46 }
  0x2d   :  { %715 = vmatprep.subr.bf16.mxu1 %v1194_v47  ;;  %702 = vmatprep.mubr.bf16.mxu0 %v1233_v1 }
  0x2e   :  { %745 = vmatprep.mubr.bf16.mxu1 %v1233_v1 }
  0x2f   :  { %673 = vmatpush1.bf16.msra.mxu0 %v1189_v48 }
  0x30   :  { %716 = vmatpush1.bf16.msra.mxu1 %v1192_v49  ;;  %674 = vmatprep.subr.bf16.mxu0 %v1197_v50 }
  0x31   :  { %717 = vmatprep.subr.bf16.mxu1 %v1200_v51 }
  0x33   :  { %675 = vmatpush1.bf16.msra.mxu0 %v1195_v52 }
  0x34   :  { %718 = vmatpush1.bf16.msra.mxu1 %v1198_v53  ;;  %676 = vmatprep.subr.bf16.mxu0 %v1203_v54 }
  0x35   :  { %719 = vmatprep.subr.bf16.mxu1 %v1206_v55 }
  0x37   :  { %677 = vmatpush1.bf16.msra.mxu0 %v1201_v56 }
  0x38   :  { %720 = vmatpush1.bf16.msra.mxu1 %v1204_v57  ;;  %678 = vmatprep.subr.bf16.mxu0 %v1209_v59 }
  0x39   :  { %721 = vmatprep.subr.bf16.mxu1 %v1212_v60 }
  0x3b   :  { %679 = vmatpush1.bf16.msra.mxu0 %v1207_v62 }
  0x3c   :  { %722 = vmatpush1.bf16.msra.mxu1 %v1210_v63  ;;  %756 = vmatprep.subr.bf16.mxu0 %v1215_v0 }
  0x3d   :  { %1104 = vmatprep.subr.bf16.mxu1 %v1234_v4 }
  0x3e   :  { %1062 = vmatmul.mubr.msk.bf16.vlgmr.msra.gmra.mrb[8].mxu0 %vm494_vm0, %v1328_v23 }
  0x3f   :  { %1063 = vmatmul.mubr.msk.bf16.vlgmr.msra.gmra.mrb[8].mxu1 %vm494_vm0, %v1328_v23  ;;  %757 = vmatpush1.bf16.msra.mxu0 %v1213_v2 }
  0x40   :  { %1105 = vmatpush3.bf16.msra.mxu1 %v1216_v3  ;;  %758 = vmatprep.subr.bf16.mxu0 %v1219_v5 }
  0x41   :  { %1106 = vmatprep.subr.bf16.mxu1 %v1234_v4  ;;  %788 = vmatprep.mubr.bf16.mxu0 %v1233_v1  ;;  %v1225_v1 = vld [vmem:[%s1598_s1 + $0x198] ss:$60 sps:$4 sm:$0xff]  }
  0x42   :  { %1114 = vmatprep.mubr.msk.bf16.mxu1 %vm1235_vm1, %v1234_v4 }
  0x43   :  { %759 = vmatpush1.bf16.msra.mxu0 %v1217_v6 }
  0x44   :  { %1107 = vmatpush3.bf16.msra.mxu1 %v1220_v7  ;;  %760 = vmatprep.subr.bf16.mxu0 %v1223_v8 }
  0x45   :  { %1108 = vmatprep.subr.bf16.mxu1 %v1234_v4 }
  0x47   :  { %761 = vmatpush1.bf16.msra.mxu0 %v1221_v9 }
  0x48   :  { %1109 = vmatpush3.bf16.msra.mxu1 %v1224_v10  ;;  %762 = vmatprep.subr.bf16.mxu0 %v1227_v11 }
  0x49   :  { %1110 = vmatprep.subr.bf16.mxu1 %v1234_v4 }
  0x4b   :  { %763 = vmatpush1.bf16.msra.mxu0 %v1225_v1 }
  0x4c   :  { %1111 = vmatpush3.bf16.msra.mxu1 %v1228_v12  ;;  %764 = vmatprep.subr.bf16.mxu0 %v1231_v13 }
  0x4d   :  { %1112 = vmatprep.subr.bf16.mxu1 %v1234_v4 }
  0x4f   :  { %765 = vmatpush1.bf16.msra.mxu0 %v1229_v14 }
  0x50   :  { %1113 = vmatpush3.bf16.msra.mxu1 %v1232_v15 }
  0x52   :  { %1064 = vmatmul.mubr.msk.bf16.vlgmr.msra.gmra.mrb[12].mxu0 %vm494_vm0, %v1328_v23 }
  0x53   :  { %1115 = vmatmul.mubr.msk.bf16.vlgmr.msra.gmra.mrb[12].mxu1 %vm494_vm0, %v1328_v23 }
  0x94   :  { %v1516_v16 = vpop.permute.xlu0 %101 }
  0x99   :  { %v1518_v17 = vpop.permute.xlu0 %106 }
  0xe9   :  { %v532_v18 = vpop.f32.mrb[0].mxu0 }
  0xea   :  { %v575_v19 = vpop.f32.mrb[0].mxu1  ;;  %v533_v20 = vadd.f32 %v532_v18, %v1516_v16  ;;  %v534_v22 = vpop.f32.mrb[1].mxu0 }
  0xeb   :  { %v576_v21 = vadd.f32 %v575_v19, %v1516_v16  ;;  %v577_v24 = vpop.f32.mrb[1].mxu1  ;;  %v535_v25 = vadd.f32 %v534_v22, %v1516_v16  ;;  %v536_v27 = vpop.f32.mrb[2].mxu0 }
  0xec   :  { %v578_v26 = vadd.f32 %v577_v24, %v1516_v16  ;;  %v579_v28 = vpop.f32.mrb[2].mxu1  ;;  %v840_v29 = vmax.f32 %v533_v20, 0.0  ;;  %v537_v30 = vadd.f32 %v536_v27, %v1518_v17  ;;  %v538_v32 = vpop.f32.mrb[3].mxu0 }
  0xed   :  { %v842_v23 = vmax.f32 %v576_v21, 0.0  ;;  %v580_v31 = vadd.f32 %v579_v28, %v1518_v17  ;;  %v581_v33 = vpop.f32.mrb[3].mxu1  ;;  %v841_v34 = vmax.f32 %v535_v25, 0.0  ;;  %v539_v36 = vadd.f32 %v538_v32, %v1518_v17 }
  0xee   :  { %v843_v35 = vmax.f32 %v578_v26, 0.0  ;;  %v582_v37 = vadd.f32 %v581_v33, %v1518_v17  ;;  %v855_v38 = vmax.f32 %v537_v30, 0.0 }
  0xef   :  { %v857_v39 = vmax.f32 %v580_v31, 0.0  ;;  %v1082_v40 = vpack.c.bf16 %v841_v34, %v840_v29  ;;  %v856_v42 = vmax.f32 %v539_v36, 0.0 }
  0xf0   :  { %v1083_v41 = vpack.c.bf16 %v843_v35, %v842_v23  ;;  %v858_v43 = vmax.f32 %v582_v37, 0.0 }
  0xf1   :  { %962 = vst [vmem:[%s1601_s3] sm:$0xff] %v1082_v40  ;;  %v1090_v44 = vpack.c.bf16 %v856_v42, %v855_v38 }
  0xf2   :  { %963 = vst [vmem:[%s1601_s3 + $0x8] sm:$0xff] %v1083_v41  ;;  %v1091_v45 = vpack.c.bf16 %v858_v43, %v857_v39 }
  0xf3   :  { %970 = vst [vmem:[%s1601_s3 + $0x3c] sm:$0xff] %v1090_v44 }
  0xf4   :  { %971 = vst [vmem:[%s1601_s3 + $0x44] sm:$0xff] %v1091_v45 }
  0xfd   :  { %v618_v46 = vpop.f32.mrb[4].mxu0 }
  0xfe   :  { %v661_v47 = vpop.f32.mrb[4].mxu1  ;;  %v619_v48 = vadd.f32 %v618_v46, %v1516_v16  ;;  %v620_v50 = vpop.f32.mrb[5].mxu0 }
  0xff   :  { %v662_v49 = vadd.f32 %v661_v47, %v1516_v16  ;;  %v663_v51 = vpop.f32.mrb[5].mxu1  ;;  %v621_v52 = vadd.f32 %v620_v50, %v1516_v16  ;;  %v622_v54 = vpop.f32.mrb[6].mxu0 }
 0x100   :  { %v664_v53 = vadd.f32 %v663_v51, %v1516_v16  ;;  %v665_v55 = vpop.f32.mrb[6].mxu1  ;;  %v844_v56 = vmax.f32 %v619_v48, 0.0  ;;  %v623_v58 = vadd.f32 %v622_v54, %v1518_v17  ;;  %v624_v60 = vpop.f32.mrb[7].mxu0 }
 0x101   :  { %v846_v57 = vmax.f32 %v662_v49, 0.0  ;;  %v666_v59 = vadd.f32 %v665_v55, %v1518_v17  ;;  %v667_v61 = vpop.f32.mrb[7].mxu1  ;;  %v845_v62 = vmax.f32 %v621_v52, 0.0  ;;  %v625_v0 = vadd.f32 %v624_v60, %v1518_v17 }
 0x102   :  { %v847_v63 = vmax.f32 %v664_v53, 0.0  ;;  %v668_v2 = vadd.f32 %v667_v61, %v1518_v17  ;;  %v859_v3 = vmax.f32 %v623_v58, 0.0 }
 0x103   :  { %v861_v4 = vmax.f32 %v666_v59, 0.0  ;;  %v1084_v5 = vpack.c.bf16 %v845_v62, %v844_v56  ;;  %v860_v7 = vmax.f32 %v625_v0, 0.0 }
 0x104   :  { %v1085_v6 = vpack.c.bf16 %v847_v63, %v846_v57  ;;  %v862_v8 = vmax.f32 %v668_v2, 0.0 }
 0x105   :  { %964 = vst [vmem:[%s1601_s3 + $0x10] sm:$0xff] %v1084_v5  ;;  %v1092_v9 = vpack.c.bf16 %v860_v7, %v859_v3 }
 0x106   :  { %965 = vst [vmem:[%s1601_s3 + $0x18] sm:$0xff] %v1085_v6  ;;  %v1093_v10 = vpack.c.bf16 %v862_v8, %v861_v4 }
 0x107   :  { %972 = vst [vmem:[%s1601_s3 + $0x4c] sm:$0xff] %v1092_v9 }
 0x108   :  { %973 = vst [vmem:[%s1601_s3 + $0x54] sm:$0xff] %v1093_v10 }
 0x111   :  { %v704_v11 = vpop.f32.mrb[8].mxu0 }
 0x112   :  { %v747_v1 = vpop.f32.mrb[8].mxu1  ;;  %v705_v12 = vadd.f32 %v704_v11, %v1516_v16  ;;  %v706_v14 = vpop.f32.mrb[9].mxu0 }
 0x113   :  { %v748_v13 = vadd.f32 %v747_v1, %v1516_v16  ;;  %v749_v15 = vpop.f32.mrb[9].mxu1  ;;  %v707_v18 = vadd.f32 %v706_v14, %v1516_v16  ;;  %v708_v20 = vpop.f32.mrb[10].mxu0 }
 0x114   :  { %v750_v19 = vadd.f32 %v749_v15, %v1516_v16  ;;  %v751_v21 = vpop.f32.mrb[10].mxu1  ;;  %v848_v22 = vmax.f32 %v705_v12, 0.0  ;;  %v709_v25 = vadd.f32 %v708_v20, %v1518_v17  ;;  %v710_v27 = vpop.f32.mrb[11].mxu0 }
 0x115   :  { %v850_v24 = vmax.f32 %v748_v13, 0.0  ;;  %v752_v26 = vadd.f32 %v751_v21, %v1518_v17  ;;  %v753_v28 = vpop.f32.mrb[11].mxu1  ;;  %v849_v29 = vmax.f32 %v707_v18, 0.0  ;;  %v711_v30 = vadd.f32 %v710_v27, %v1518_v17 }
 0x116   :  { %v851_v23 = vmax.f32 %v750_v19, 0.0  ;;  %v754_v31 = vadd.f32 %v753_v28, %v1518_v17  ;;  %v863_v32 = vmax.f32 %v709_v25, 0.0 }
 0x117   :  { %v865_v33 = vmax.f32 %v752_v26, 0.0  ;;  %v1086_v34 = vpack.c.bf16 %v849_v29, %v848_v22  ;;  %v864_v36 = vmax.f32 %v711_v30, 0.0 }
 0x118   :  { %v1087_v35 = vpack.c.bf16 %v851_v23, %v850_v24  ;;  %v866_v37 = vmax.f32 %v754_v31, 0.0 }
 0x119   :  { %966 = vst [vmem:[%s1601_s3 + $0x20] sm:$0xff] %v1086_v34  ;;  %v1094_v38 = vpack.c.bf16 %v864_v36, %v863_v32 }
 0x11a   :  { %967 = vst [vmem:[%s1601_s3 + $0x28] sm:$0xff] %v1087_v35  ;;  %v1095_v39 = vpack.c.bf16 %v866_v37, %v865_v33 }
 0x11b   :  { %974 = vst [vmem:[%s1601_s3 + $0x5c] sm:$0xff] %v1094_v38 }
 0x11c   :  { %975 = vst [vmem:[%s1601_s3 + $0x64] sm:$0xff] %v1095_v39 }
 0x125   :  { %v790_v40 = vpop.f32.mrb[12].mxu0 }
 0x126   :  { %v833_v41 = vpop.f32.mrb[12].mxu1  ;;  %v791_v42 = vadd.f32 %v790_v40, %v1516_v16  ;;  %v792_v44 = vpop.f32.mrb[13].mxu0 }
 0x127   :  { %v834_v43 = vadd.f32 %v833_v41, %v1516_v16  ;;  %v1116_v45 = vpop.f32.mrb[13].mxu1  ;;  %v793_v46 = vadd.f32 %v792_v44, %v1516_v16  ;;  %v794_v47 = vpop.f32.mrb[14].mxu0 }
 0x128   :  { %v836_v48 = vpop.f32.mrb[14].mxu1  ;;  %v852_v49 = vmax.f32 %v791_v42, 0.0  ;;  %v795_v51 = vadd.f32 %v794_v47, %v1518_v17  ;;  %v796_v53 = vpop.f32.mrb[15].mxu0 }
 0x129   :  { %v854_v50 = vmax.f32 %v834_v43, 0.0  ;;  %v837_v52 = vadd.f32 %v836_v48, %v1518_v17  ;;  %v1117_v54 = vpop.f32.mrb[15].mxu1  ;;  %v853_v55 = vmax.f32 %v793_v46, 0.0  ;;  %v797_v56 = vadd.f32 %v796_v53, %v1518_v17 }
 0x12a   :  { %v867_v58 = vmax.f32 %v795_v51, 0.0 }
 0x12b   :  { %v1089_v57 = vpack.c.bf16 %v854_v50, %v854_v50  ;;  %v869_v59 = vmax.f32 %v837_v52, 0.0  ;;  %v1088_v60 = vpack.c.bf16 %v853_v55, %v852_v49  ;;  %v868_v61 = vmax.f32 %v797_v56, 0.0 }
 0x12d   :  { %969 = vst [vmem:[%s1601_s3 + $0x38] sm:$0xf] %v1089_v57  ;;  %v1097_v16 = vpack.c.bf16 %v869_v59, %v869_v59  ;;  %968 = vst [vmem:[%s1601_s3 + $0x30] sm:$0xff] %v1088_v60  ;;  %v1096_v62 = vpack.c.bf16 %v868_v61, %v867_v58 }
 0x12f   :  { %977 = vst [vmem:[%s1601_s3 + $0x74] sm:$0xf] %v1097_v16  ;;  %976 = vst [vmem:[%s1601_s3 + $0x6c] sm:$0xff] %v1096_v62 }

// kernel: single_q_forward.6
= control target key start
LH: loop header
LB: loop body
LE: loop exit
PB: predicated region body
PF: predicated region fallthrough
CT: control target
= control target key end

     0   :  { %v1122_v1 = vmov 0   ;;  %vm585_vm0 = vcmask 130048   ;;  %s1451_s1 = inlined_call_operand.vmem [shape: bf16[400,384], index: 1, kind: input, shape index: {}]   ;;  %s1452_s0 = inlined_call_operand.vmem [shape: bf16[32,400], index: 0, kind: input, shape index: {}]   ;;  %s1453_s2 = inlined_call_operand.vmem [shape: f32[32,1], index: 2, kind: input, shape index: {}]   ;;  %s1454_s3 = inlined_call_operand.vmem [shape: bf16[32,384], index: 3, kind: output, shape index: {}]  }
   0x1   :  { %v1010_v0 = vld [vmem:[%s1451_s1 + $0x4] ss:$12 sps:$4 sm:$0xff]   ;;  %1008 = vset.pattern.permute.xlu0 %v1122_v1  ;;  %1009 = vset.pattern.permute.xlu1 %v1122_v1  ;;  %v1012_v2 = vld [vmem:[%s1451_s1 + $0xc8] ss:$12 sps:$4 sm:$0xff]   ;;  %v1013_v3 = vld [vmem:[%s1451_s1] ss:$12 sps:$4 sm:$0xff]  }
   0x2   :  { %592 = vmatprep.subr.bf16.mxu0 %v1010_v0  ;;  %963 = vmatprep.subr.bf16.mxu1 %v1012_v2  ;;  %v1014_v4 = vld [vmem:[%s1451_s1 + $0x8] ss:$12 sps:$4 sm:$0xff]   ;;  %v1017_v6 = vld [vmem:[%s1451_s1 + $0xe0] ss:$12 sps:$4 sm:$0xff]   ;;  %v1018_v7 = vld [vmem:[%s1451_s1 + $0x18] ss:$12 sps:$4 sm:$0xff]  }
   0x3   :  { %593 = vmatpush1.bf16.msra.mxu0 %v1013_v3  ;;  %v1015_v5 = vld [vmem:[%s1451_s1 + $0x1c] ss:$12 sps:$4 sm:$0xff]   ;;  %964 = vmatpush3.bf16.msra.mxu1 %v1014_v4  ;;  %v1019_v8 = vld [vmem:[%s1451_s1 + $0x20] ss:$12 sps:$4 sm:$0xff]   ;;  %v1022_v10 = vld [vmem:[%s1451_s1 + $0xf8] ss:$12 sps:$4 sm:$0xff]  }
   0x4   :  { %594 = vmatprep.subr.bf16.mxu0 %v1015_v5  ;;  %965 = vmatprep.subr.bf16.mxu1 %v1017_v6  ;;  %v1020_v9 = vld [vmem:[%s1451_s1 + $0x34] ss:$12 sps:$4 sm:$0xff]   ;;  %v1023_v11 = vld [vmem:[%s1451_s1 + $0x30] ss:$12 sps:$4 sm:$0xff]   ;;  %v1024_v12 = vld [vmem:[%s1451_s1 + $0x38] ss:$12 sps:$4 sm:$0xff]  }
   0x5   :  { %v1025_v13 = vld [vmem:[%s1451_s1 + $0x4c] ss:$12 sps:$4 sm:$0xff]   ;;  %v1027_v14 = vld [vmem:[%s1451_s1 + $0x110] ss:$12 sps:$4 sm:$0xff]   ;;  %v1028_v15 = vld [vmem:[%s1451_s1 + $0x48] ss:$12 sps:$4 sm:$0xff]  }
   0x6   :  { %v1029_v16 = vld [vmem:[%s1451_s1 + $0x50] ss:$12 sps:$4 sm:$0xff]   ;;  %v1032_v18 = vld [vmem:[%s1451_s1 + $0x128] ss:$12 sps:$4 sm:$0xff]   ;;  %v1033_v19 = vld [vmem:[%s1451_s1 + $0x60] ss:$12 sps:$4 sm:$0xff]  }
   0x7   :  { %595 = vmatpush1.bf16.msra.mxu0 %v1018_v7  ;;  %966 = vmatpush3.bf16.msra.mxu1 %v1019_v8  ;;  %v1030_v17 = vld [vmem:[%s1451_s1 + $0x64] ss:$12 sps:$4 sm:$0xff]   ;;  %v1034_v20 = vld [vmem:[%s1451_s1 + $0x68] ss:$12 sps:$4 sm:$0xff]   ;;  %v1037_v22 = vld [vmem:[%s1451_s1 + $0x140] ss:$12 sps:$4 sm:$0xff]  }
   0x8   :  { %596 = vmatprep.subr.bf16.mxu0 %v1020_v9  ;;  %967 = vmatprep.subr.bf16.mxu1 %v1022_v10  ;;  %v1035_v21 = vld [vmem:[%s1451_s1 + $0x7c] ss:$12 sps:$4 sm:$0xff]   ;;  %v1038_v23 = vld [vmem:[%s1451_s1 + $0x78] ss:$12 sps:$4 sm:$0xff]   ;;  %v1039_v24 = vld [vmem:[%s1451_s1 + $0x80] ss:$12 sps:$4 sm:$0xff]  }
   0x9   :  { %v1040_v25 = vld [vmem:[%s1451_s1 + $0x94] ss:$12 sps:$4 sm:$0xff]   ;;  %v1042_v26 = vld [vmem:[%s1451_s1 + $0x158] ss:$12 sps:$4 sm:$0xff]   ;;  %v1043_v27 = vld [vmem:[%s1451_s1 + $0x90] ss:$12 sps:$4 sm:$0xff]  }
   0xa   :  { %v1044_v28 = vld [vmem:[%s1451_s1 + $0x98] ss:$12 sps:$4 sm:$0xff]   ;;  %v1047_v30 = vld [vmem:[%s1451_s1 + $0x170] ss:$12 sps:$4 sm:$0xff]   ;;  %v1048_v31 = vld [vmem:[%s1451_s1 + $0xa8] ss:$12 sps:$4 sm:$0xff]  }
   0xb   :  { %597 = vmatpush1.bf16.msra.mxu0 %v1023_v11  ;;  %968 = vmatpush3.bf16.msra.mxu1 %v1024_v12  ;;  %v1045_v29 = vld [vmem:[%s1451_s1 + $0xac] ss:$12 sps:$4 sm:$0xff]   ;;  %v1049_v32 = vld [vmem:[%s1451_s1 + $0xb0] ss:$12 sps:$4 sm:$0xff]   ;;  %v1054_v33 = vld [vmem:[%s1452_s0 + $0x4] ss:$16 sps:$4 sm:$0xff]  }
   0xc   :  { %598 = vmatprep.subr.bf16.mxu0 %v1025_v13  ;;  %969 = vmatprep.subr.bf16.mxu1 %v1027_v14  ;;  %v1050_v34 = vld [vmem:[%s1451_s1 + $0xc4] ss:$12 sps:$4 sm:$0xff]   ;;  %v1055_v36 = vld [vmem:[%s1451_s1 + $0xc0] ss:$12 sps:$4 sm:$0xff]   ;;  %v1056_v37 = vld [vmem:[%s1451_s1 + $0x188] ss:$12 sps:$4 sm:$0xff]  }
   0xd   :  { %730 = vmatprep.mubr.bf16.mxu1 %v1054_v33  ;;  %v1250_v35 = vld [vmem:[%s1452_s0] ss:$16 sps:$4 sm:$0xff]   ;;  %624 = vmatprep.mubr.bf16.mxu0 %v1054_v33  ;;  %v1057_v38 = vld [vmem:[%s1451_s1 + $0xdc] ss:$12 sps:$4 sm:$0xff]   ;;  %v1059_v39 = vld [vmem:[%s1451_s1 + $0xd8] ss:$12 sps:$4 sm:$0xff]  }
   0xe   :  { %v1060_v40 = vld [vmem:[%s1451_s1 + $0x1a0] ss:$12 sps:$4 sm:$0xff]   ;;  %v1063_v42 = vld [vmem:[%s1451_s1 + $0xf0] ss:$12 sps:$4 sm:$0xff]   ;;  %v1064_v43 = vld [vmem:[%s1451_s1 + $0x1b8] ss:$12 sps:$4 sm:$0xff]  }
   0xf   :  { %599 = vmatpush1.bf16.msra.mxu0 %v1028_v15  ;;  %970 = vmatpush3.bf16.msra.mxu1 %v1029_v16  ;;  %v1061_v41 = vld [vmem:[%s1451_s1 + $0xf4] ss:$12 sps:$4 sm:$0xff]   ;;  %v1065_v44 = vld [vmem:[%s1451_s1 + $0x10c] ss:$12 sps:$4 sm:$0xff]   ;;  %v1068_v46 = vld [vmem:[%s1451_s1 + $0x1d0] ss:$12 sps:$4 sm:$0xff]  }
  0x10   :  { %600 = vmatprep.subr.bf16.mxu0 %v1030_v17  ;;  %971 = vmatprep.subr.bf16.mxu1 %v1032_v18  ;;  %v1067_v45 = vld [vmem:[%s1451_s1 + $0x108] ss:$12 sps:$4 sm:$0xff]   ;;  %v1069_v47 = vld [vmem:[%s1451_s1 + $0x124] ss:$12 sps:$4 sm:$0xff]   ;;  %v1071_v50 = vld [vmem:[%s1451_s1 + $0x120] ss:$12 sps:$4 sm:$0xff]  }
  0x11   :  { %v1081_v48 = vld [vmem:[%s1452_s0 + $0x24] ss:$16 sps:$4 sm:$0xff]   ;;  %v1299_v49 = vld [vmem:[%s1452_s0 + $0x20] ss:$16 sps:$4 sm:$0xff]   ;;  %v1073_v52 = vld [vmem:[%s1451_s1 + $0x13c] ss:$12 sps:$4 sm:$0xff]  }
  0x12   :  { %v1072_v51 = vld [vmem:[%s1451_s1 + $0x1e8] ss:$12 sps:$4 sm:$0xff]   ;;  %v1094_v53 = vld [vmem:[%s1452_s0 + $0xc] ss:$16 sps:$4 sm:$0xff]   ;;  %v1075_v54 = vld [vmem:[%s1451_s1 + $0x138] ss:$12 sps:$4 sm:$0xff]  }
  0x13   :  { %601 = vmatpush1.bf16.msra.mxu0 %v1033_v19  ;;  %972 = vmatpush3.bf16.msra.mxu1 %v1034_v20  ;;  %v1076_v55 = vld [vmem:[%s1451_s1 + $0x200] ss:$12 sps:$4 sm:$0xff]   ;;  %v1079_v57 = vld [vmem:[%s1451_s1 + $0x150] ss:$12 sps:$4 sm:$0xff]   ;;  %v1080_v58 = vld [vmem:[%s1451_s1 + $0x218] ss:$12 sps:$4 sm:$0xff]  }
  0x14   :  { %602 = vmatprep.subr.bf16.mxu0 %v1035_v21  ;;  %973 = vmatprep.subr.bf16.mxu1 %v1037_v22  ;;  %v1077_v56 = vld [vmem:[%s1451_s1 + $0x154] ss:$12 sps:$4 sm:$0xff]   ;;  %v1083_v59 = vld [vmem:[%s1451_s1 + $0x16c] ss:$12 sps:$4 sm:$0xff]   ;;  %v1087_v61 = vld [vmem:[%s1451_s1 + $0x230] ss:$12 sps:$4 sm:$0xff]  }
  0x15   :  { %v1086_v60 = vld [vmem:[%s1451_s1 + $0x168] ss:$12 sps:$4 sm:$0xff]   ;;  %v1090_v62 = vld [vmem:[%s1451_s1 + $0x184] ss:$12 sps:$4 sm:$0xff]   ;;  %v1088_v0 = vld [vmem:[%s1451_s1 + $0x180] ss:$12 sps:$4 sm:$0xff]  }
  0x16   :  { %v123_v63 = vld [vmem:[%s1453_s2] sm:$0xff]  ;;  %v125_v2 = vld [vmem:[%s1453_s2 + $0x10] sm:$0xff]  ;;  %v1097_v4 = vld [vmem:[%s1451_s1 + $0x19c] ss:$12 sps:$4 sm:$0xff]  }
  0x17   :  { %603 = vmatpush1.bf16.msra.mxu0 %v1038_v23  ;;  %974 = vmatpush3.bf16.msra.mxu1 %v1039_v24  ;;  %v1091_v3 = vld [vmem:[%s1451_s1 + $0x248] ss:$12 sps:$4 sm:$0xff]   ;;  %v126_v6 = vld [vmem:[%s1453_s2 + $0x18] sm:$0xff]  ;;  %v1106_v14 = vld [vmem:[%s1451_s1 + $0x1e4] ss:$12 sps:$4 sm:$0xff]  }
  0x18   :  { %604 = vmatprep.subr.bf16.mxu0 %v1040_v25  ;;  %975 = vmatprep.subr.bf16.mxu1 %v1042_v26  ;;  %v124_v5 = vld [vmem:[%s1453_s2 + $0x8] sm:$0xff]  ;;  %v1100_v8 = vld [vmem:[%s1451_s1 + $0x1b4] ss:$12 sps:$4 sm:$0xff]   ;;  %v1098_v10 = vld [vmem:[%s1451_s1 + $0x1b0] ss:$12 sps:$4 sm:$0xff]  }
  0x19   :  { %129 = vperm.xlu0 %1008, %v123_v63   ;;  %139 = vperm.xlu1 %1009, %v125_v2   ;;  %v1092_v7 = vld [vmem:[%s1452_s0 + $0x8] ss:$16 sps:$4 sm:$0xff]   ;;  %v1116_v9 = vld [vmem:[%s1452_s0 + $0x2c] ss:$16 sps:$4 sm:$0xff]   ;;  %v1112_v18 = vld [vmem:[%s1451_s1 + $0x214] ss:$12 sps:$4 sm:$0xff]  }
  0x1a   :  { %v1103_v11 = vld [vmem:[%s1451_s1 + $0x1cc] ss:$12 sps:$4 sm:$0xff]   ;;  %v1101_v12 = vld [vmem:[%s1451_s1 + $0x1c8] ss:$12 sps:$4 sm:$0xff]   ;;  %v1110_v19 = vld [vmem:[%s1451_s1 + $0x210] ss:$12 sps:$4 sm:$0xff]  }
  0x1b   :  { %605 = vmatpush1.bf16.msra.mxu0 %v1043_v27  ;;  %976 = vmatpush3.bf16.msra.mxu1 %v1044_v28  ;;  %v1118_v13 = vld [vmem:[%s1452_s0 + $0x28] ss:$16 sps:$4 sm:$0xff]   ;;  %v1104_v15 = vld [vmem:[%s1451_s1 + $0x1e0] ss:$12 sps:$4 sm:$0xff]   ;;  %v1121_v22 = vld [vmem:[%s1451_s1 + $0x244] ss:$12 sps:$4 sm:$0xff]  }
  0x1c   :  { %606 = vmatprep.subr.bf16.mxu0 %v1045_v29  ;;  %977 = vmatprep.subr.bf16.mxu1 %v1047_v30  ;;  %v1109_v16 = vld [vmem:[%s1451_s1 + $0x1fc] ss:$12 sps:$4 sm:$0xff]   ;;  %v1107_v17 = vld [vmem:[%s1451_s1 + $0x1f8] ss:$12 sps:$4 sm:$0xff]   ;;  %v1119_v23 = vld [vmem:[%s1451_s1 + $0x240] ss:$12 sps:$4 sm:$0xff]  }
  0x1d   :  { %134 = vperm.xlu0 %1008, %v124_v5   ;;  %144 = vperm.xlu1 %1009, %v126_v6   ;;  %v1115_v20 = vld [vmem:[%s1451_s1 + $0x22c] ss:$12 sps:$4 sm:$0xff]   ;;  %v1113_v21 = vld [vmem:[%s1451_s1 + $0x228] ss:$12 sps:$4 sm:$0xff]  }
  0x1f   :  { %607 = vmatpush1.bf16.msra.mxu0 %v1048_v31  ;;  %978 = vmatpush3.bf16.msra.mxu1 %v1049_v32 }
  0x20   :  { %608 = vmatprep.subr.bf16.mxu0 %v1050_v34  ;;  %747 = vmatprep.subr.bf16.mxu1 %v1122_v1 }
  0x22   :  { %731 = vmatmul.mubr.bf16.vlgmr.msra.gmra.mrb[0].mxu1 %v1250_v35 }
  0x23   :  { %609 = vmatpush1.bf16.msra.mxu0 %v1055_v36  ;;  %748 = vmatpush1.bf16.msra.mxu1 %v1056_v37 }
  0x24   :  { %610 = vmatprep.subr.bf16.mxu0 %v1057_v38  ;;  %749 = vmatprep.subr.bf16.mxu1 %v1122_v1 }
  0x25   :  { %738 = vmatprep.mubr.bf16.mxu1 %v1081_v48 }
  0x27   :  { %611 = vmatpush1.bf16.msra.mxu0 %v1059_v39  ;;  %750 = vmatpush1.bf16.msra.mxu1 %v1060_v40 }
  0x28   :  { %612 = vmatprep.subr.bf16.mxu0 %v1061_v41  ;;  %751 = vmatprep.subr.bf16.mxu1 %v1122_v1 }
  0x2a   :  { %739 = vmatmul.mubr.bf16.gmra.mrb[4].mxu1 %v1299_v49 }
  0x2b   :  { %613 = vmatpush1.bf16.msra.mxu0 %v1063_v42  ;;  %752 = vmatpush1.bf16.msra.mxu1 %v1064_v43 }
  0x2c   :  { %614 = vmatprep.subr.bf16.mxu0 %v1065_v44  ;;  %753 = vmatprep.subr.bf16.mxu1 %v1122_v1 }
  0x2d   :  { %945 = vmatprep.mubr.msk.bf16.mxu1 %vm585_vm0, %v1094_v53 }
  0x2f   :  { %615 = vmatpush1.bf16.msra.mxu0 %v1067_v45  ;;  %754 = vmatpush1.bf16.msra.mxu1 %v1068_v46 }
  0x30   :  { %616 = vmatprep.subr.bf16.mxu0 %v1069_v47  ;;  %755 = vmatprep.subr.bf16.mxu1 %v1122_v1 }
  0x33   :  { %617 = vmatpush1.bf16.msra.mxu0 %v1071_v50  ;;  %756 = vmatpush1.bf16.msra.mxu1 %v1072_v51 }
  0x34   :  { %618 = vmatprep.subr.bf16.mxu0 %v1073_v52  ;;  %757 = vmatprep.subr.bf16.mxu1 %v1122_v1 }
  0x37   :  { %619 = vmatpush1.bf16.msra.mxu0 %v1075_v54  ;;  %758 = vmatpush1.bf16.msra.mxu1 %v1076_v55 }
  0x38   :  { %620 = vmatprep.subr.bf16.mxu0 %v1077_v56  ;;  %759 = vmatprep.subr.bf16.mxu1 %v1122_v1 }
  0x3b   :  { %621 = vmatpush1.bf16.msra.mxu0 %v1079_v57  ;;  %760 = vmatpush1.bf16.msra.mxu1 %v1080_v58 }
  0x3c   :  { %622 = vmatprep.subr.bf16.mxu0 %v1083_v59  ;;  %761 = vmatprep.subr.bf16.mxu1 %v1122_v1 }
  0x3f   :  { %623 = vmatpush1.bf16.msra.mxu0 %v1086_v60  ;;  %762 = vmatpush1.bf16.msra.mxu1 %v1087_v61 }
  0x40   :  { %645 = vmatprep.subr.bf16.mxu0 %v1090_v62  ;;  %763 = vmatprep.subr.bf16.mxu1 %v1122_v1  ;;  %v1095_v1 = vld [vmem:[%s1451_s1 + $0x198] ss:$12 sps:$4 sm:$0xff]  }
  0x42   :  { %625 = vmatmul.mubr.bf16.vlgmr.msra.gmra.mrb[0].mxu0 %v1250_v35 }
  0x43   :  { %646 = vmatpush1.bf16.msra.mxu0 %v1088_v0  ;;  %634 = vmatprep.mubr.bf16.mxu0 %v1081_v48 }
  0x44   :  { %764 = vmatpush1.bf16.msra.mxu1 %v1091_v3  ;;  %647 = vmatprep.subr.bf16.mxu0 %v1097_v4 }
  0x47   :  { %780 = vmatmul.mubr.bf16.vlgmr.msra.gmra.mrb[8].mxu1 %v1092_v7  ;;  %648 = vmatpush1.bf16.msra.mxu0 %v1095_v1 }
  0x48   :  { %649 = vmatprep.subr.bf16.mxu0 %v1100_v8  ;;  %946 = vmatprep.mubr.msk.bf16.mxu1 %vm585_vm0, %v1116_v9 }
  0x4a   :  { %635 = vmatmul.mubr.bf16.gmra.mrb[4].mxu0 %v1299_v49 }
  0x4b   :  { %650 = vmatpush1.bf16.msra.mxu0 %v1098_v10  ;;  %943 = vmatprep.mubr.msk.bf16.mxu0 %vm585_vm0, %v1094_v53 }
  0x4c   :  { %651 = vmatprep.subr.bf16.mxu0 %v1103_v11 }
  0x4f   :  { %652 = vmatpush1.bf16.msra.mxu0 %v1101_v12  ;;  %788 = vmatmul.mubr.bf16.gmra.mrb[12].mxu1 %v1118_v13 }
  0x50   :  { %653 = vmatprep.subr.bf16.mxu0 %v1106_v14 }
  0x53   :  { %654 = vmatpush1.bf16.msra.mxu0 %v1104_v15 }
  0x54   :  { %655 = vmatprep.subr.bf16.mxu0 %v1109_v16 }
  0x57   :  { %656 = vmatpush1.bf16.msra.mxu0 %v1107_v17 }
  0x58   :  { %657 = vmatprep.subr.bf16.mxu0 %v1112_v18 }
  0x5b   :  { %658 = vmatpush1.bf16.msra.mxu0 %v1110_v19 }
  0x5c   :  { %659 = vmatprep.subr.bf16.mxu0 %v1115_v20 }
  0x5f   :  { %660 = vmatpush1.bf16.msra.mxu0 %v1113_v21 }
  0x60   :  { %661 = vmatprep.subr.bf16.mxu0 %v1121_v22 }
  0x63   :  { %662 = vmatpush1.bf16.msra.mxu0 %v1119_v23 }
  0x66   :  { %678 = vmatmul.mubr.bf16.vlgmr.msra.gmra.mrb[0].mxu0 %v1092_v7 }
  0x67   :  { %944 = vmatprep.mubr.msk.bf16.mxu0 %vm585_vm0, %v1116_v9 }
  0x6e   :  { %688 = vmatmul.mubr.bf16.gmra.mrb[4].mxu0 %v1118_v13 }
  0x98   :  { %v130_v36 = vpop.permute.xlu0 %129  ;;  %v140_v39 = vpop.permute.xlu1 %139 }
  0x9c   :  { %v135_v37 = vpop.permute.xlu0 %134  ;;  %v145_v48 = vpop.permute.xlu1 %144 }
  0xf5   :  { %v979_v24 = vpop.f32.mrb[0].mxu1 }
  0xf6   :  { %v980_v25 = vpop.f32.mrb[1].mxu1 }
  0xf7   :  { %v981_v26 = vadd.f32 %v980_v25, %v979_v24  ;;  %v982_v27 = vpop.f32.mrb[2].mxu1 }
  0xf8   :  { %v983_v28 = vpop.f32.mrb[3].mxu1 }
  0xf9   :  { %v984_v29 = vadd.f32 %v983_v28, %v982_v27  ;;  %v733_v38 = vadd.f32 %v981_v26, %v130_v36 }
  0xfb   :  { %v736_v40 = vadd.f32 %v984_v29, %v135_v37 }
  0xfd   :  { %v985_v30 = vpop.f32.mrb[4].mxu1 }
  0xfe   :  { %v986_v31 = vpop.f32.mrb[5].mxu1 }
  0xff   :  { %v987_v32 = vadd.f32 %v986_v31, %v985_v30  ;;  %v988_v33 = vpop.f32.mrb[6].mxu1 }
 0x100   :  { %v989_v34 = vpop.f32.mrb[7].mxu1 }
 0x101   :  { %v990_v35 = vadd.f32 %v989_v34, %v988_v33  ;;  %v741_v51 = vadd.f32 %v987_v32, %v140_v39 }
 0x103   :  { %v744_v53 = vadd.f32 %v990_v35, %v145_v48 }
 0x11a   :  { %v781_v41 = vpop.f32.mrb[8].mxu1 }
 0x11b   :  { %v782_v42 = vadd.f32 %v781_v41, %v733_v38  ;;  %v783_v43 = vpop.f32.mrb[9].mxu1 }
 0x11c   :  { %v784_v44 = vpop.f32.mrb[10].mxu1 }
 0x11d   :  { %v798_v45 = vmax.f32 %v782_v42, 0.0  ;;  %v785_v46 = vadd.f32 %v784_v44, %v736_v40  ;;  %v786_v47 = vpop.f32.mrb[11].mxu1 }
 0x11f   :  { %v956_v49 = vpack.c.bf16 %v798_v45, %v798_v45  ;;  %v801_v50 = vmax.f32 %v785_v46, 0.0 }
 0x121   :  { %849 = vst [vmem:[%s1454_s3 + $0x8] sm:$0xf] %v956_v49  ;;  %v958_v52 = vpack.c.bf16 %v801_v50, %v801_v50 }
 0x122   :  { %v789_v54 = vpop.f32.mrb[12].mxu1 }
 0x123   :  { %851 = vst [vmem:[%s1454_s3 + $0x14] sm:$0xf] %v958_v52  ;;  %v790_v55 = vadd.f32 %v789_v54, %v741_v51  ;;  %v791_v56 = vpop.f32.mrb[13].mxu1 }
 0x124   :  { %v792_v57 = vpop.f32.mrb[14].mxu1 }
 0x125   :  { %v804_v58 = vmax.f32 %v790_v55, 0.0  ;;  %v793_v59 = vadd.f32 %v792_v57, %v744_v53  ;;  %v794_v60 = vpop.f32.mrb[15].mxu1 }
 0x127   :  { %v960_v61 = vpack.c.bf16 %v804_v58, %v804_v58  ;;  %v807_v62 = vmax.f32 %v793_v59, 0.0 }
 0x129   :  { %853 = vst [vmem:[%s1454_s3 + $0x20] sm:$0xf] %v960_v61  ;;  %v962_v63 = vpack.c.bf16 %v807_v62, %v807_v62 }
 0x12b   :  { %855 = vst [vmem:[%s1454_s3 + $0x2c] sm:$0xf] %v962_v63 }
 0x139   :  { %v679_v0 = vpop.f32.mrb[0].mxu0 }
 0x13a   :  { %v991_v2 = vadd.f32 %v679_v0, %v130_v36  ;;  %v681_v3 = vpop.f32.mrb[1].mxu0 }
 0x13b   :  { %v992_v4 = vadd.f32 %v681_v3, %v130_v36  ;;  %v683_v5 = vpop.f32.mrb[2].mxu0 }
 0x13c   :  { %v796_v6 = vmax.f32 %v991_v2, 0.0  ;;  %v993_v7 = vadd.f32 %v683_v5, %v135_v37  ;;  %v685_v1 = vpop.f32.mrb[3].mxu0 }
 0x13d   :  { %v797_v8 = vmax.f32 %v992_v4, 0.0  ;;  %v994_v9 = vadd.f32 %v685_v1, %v135_v37 }
 0x13e   :  { %v799_v10 = vmax.f32 %v993_v7, 0.0 }
 0x13f   :  { %v955_v11 = vpack.c.bf16 %v797_v8, %v796_v6  ;;  %v800_v12 = vmax.f32 %v994_v9, 0.0 }
 0x141   :  { %848 = vst [vmem:[%s1454_s3] sm:$0xff] %v955_v11  ;;  %v957_v13 = vpack.c.bf16 %v800_v12, %v799_v10  ;;  %v689_v14 = vpop.f32.mrb[4].mxu0 }
 0x142   :  { %v995_v15 = vadd.f32 %v689_v14, %v140_v39  ;;  %v691_v16 = vpop.f32.mrb[5].mxu0 }
 0x143   :  { %850 = vst [vmem:[%s1454_s3 + $0xc] sm:$0xff] %v957_v13  ;;  %v996_v17 = vadd.f32 %v691_v16, %v140_v39  ;;  %v693_v18 = vpop.f32.mrb[6].mxu0 }
 0x144   :  { %v802_v19 = vmax.f32 %v995_v15, 0.0  ;;  %v997_v20 = vadd.f32 %v693_v18, %v145_v48  ;;  %v695_v21 = vpop.f32.mrb[7].mxu0 }
 0x145   :  { %v803_v22 = vmax.f32 %v996_v17, 0.0  ;;  %v998_v23 = vadd.f32 %v695_v21, %v145_v48 }
 0x146   :  { %v805_v24 = vmax.f32 %v997_v20, 0.0 }
 0x147   :  { %v959_v25 = vpack.c.bf16 %v803_v22, %v802_v19  ;;  %v806_v26 = vmax.f32 %v998_v23, 0.0 }
 0x149   :  { %852 = vst [vmem:[%s1454_s3 + $0x18] sm:$0xff] %v959_v25  ;;  %v961_v27 = vpack.c.bf16 %v806_v26, %v805_v24 }
 0x14b   :  { %854 = vst [vmem:[%s1454_s3 + $0x24] sm:$0xff] %v961_v27 }

// kernel: single_q_forward.7
= control target key start
LH: loop header
LB: loop body
LE: loop exit
PB: predicated region body
PF: predicated region fallthrough
CT: control target
= control target key end

     0   :  { %v1010_v1 = vmov 0   ;;  %vm525_vm0 = vcmask 261120   ;;  %s1243_s1 = inlined_call_operand.vmem [shape: bf16[800,128], index: 1, kind: input, shape index: {}]   ;;  %s1244_s0 = inlined_call_operand.vmem [shape: bf16[32,800], index: 0, kind: input, shape index: {}]   ;;  %s1245_s2 = inlined_call_operand.vmem [shape: f32[32,1], index: 2, kind: input, shape index: {}]   ;;  %s1246_s3 = inlined_call_operand.vmem [shape: bf16[32,128], index: 3, kind: output, shape index: {}]  }
   0x1   :  { %v940_v0 = vld [vmem:[%s1243_s1 + $0x40] sm:$0xff]   ;;  %938 = vset.pattern.permute.xlu0 %v1010_v1  ;;  %939 = vset.pattern.permute.xlu1 %v1010_v1  ;;  %v944_v5 = vld [vmem:[%s1243_s1 + $0x48] sm:$0xff]   ;;  %v948_v9 = vld [vmem:[%s1243_s1 + $0x50] sm:$0xff]  }
   0x2   :  { %v941_v2 = vld [vmem:[%s1243_s1] sm:$0xff]   ;;  %841 = vmatprep.subr.bf16.mxu0 %v940_v0  ;;  %v945_v6 = vld [vmem:[%s1243_s1 + $0x8] sm:$0xff]   ;;  %v949_v10 = vld [vmem:[%s1243_s1 + $0x10] sm:$0xff]  }
   0x3   :  { %v942_v3 = vld [vmem:[%s1243_s1 + $0xc0] sm:$0xff]   ;;  %842 = vmatpush3.bf16.msra.mxu0 %v941_v2  ;;  %v946_v7 = vld [vmem:[%s1243_s1 + $0xc8] sm:$0xff]   ;;  %v950_v11 = vld [vmem:[%s1243_s1 + $0xd0] sm:$0xff]  }
   0x4   :  { %v943_v4 = vld [vmem:[%s1243_s1 + $0x80] sm:$0xff]   ;;  %869 = vmatprep.subr.bf16.mxu1 %v942_v3  ;;  %843 = vmatprep.subr.bf16.mxu0 %v944_v5  ;;  %v947_v8 = vld [vmem:[%s1243_s1 + $0x88] sm:$0xff]   ;;  %v951_v12 = vld [vmem:[%s1243_s1 + $0x90] sm:$0xff]  }
   0x5   :  { %870 = vmatpush3.bf16.msra.mxu1 %v943_v4  ;;  %v952_v13 = vld [vmem:[%s1243_s1 + $0x58] sm:$0xff]   ;;  %v956_v17 = vld [vmem:[%s1243_s1 + $0x60] sm:$0xff]   ;;  %v960_v21 = vld [vmem:[%s1243_s1 + $0x68] sm:$0xff]  }
   0x6   :  { %871 = vmatprep.subr.bf16.mxu1 %v946_v7  ;;  %v953_v14 = vld [vmem:[%s1243_s1 + $0x18] sm:$0xff]   ;;  %v957_v18 = vld [vmem:[%s1243_s1 + $0x20] sm:$0xff]   ;;  %v961_v22 = vld [vmem:[%s1243_s1 + $0x28] sm:$0xff]  }
   0x7   :  { %844 = vmatpush3.bf16.msra.mxu0 %v945_v6  ;;  %v954_v15 = vld [vmem:[%s1243_s1 + $0xd8] sm:$0xff]   ;;  %v958_v19 = vld [vmem:[%s1243_s1 + $0xe0] sm:$0xff]   ;;  %v962_v23 = vld [vmem:[%s1243_s1 + $0xe8] sm:$0xff]  }
   0x8   :  { %845 = vmatprep.subr.bf16.mxu0 %v948_v9  ;;  %v955_v16 = vld [vmem:[%s1243_s1 + $0x98] sm:$0xff]   ;;  %v959_v20 = vld [vmem:[%s1243_s1 + $0xa0] sm:$0xff]   ;;  %v963_v24 = vld [vmem:[%s1243_s1 + $0xa8] sm:$0xff]  }
   0x9   :  { %872 = vmatpush3.bf16.msra.mxu1 %v947_v8  ;;  %v964_v25 = vld [vmem:[%s1243_s1 + $0x70] sm:$0xff]   ;;  %v968_v29 = vld [vmem:[%s1243_s1 + $0x78] sm:$0xff]   ;;  %v973_v33 = vld [vmem:[%s1244_s0 + $0x4] ss:$28 sps:$4 sm:$0xff]  }
   0xa   :  { %873 = vmatprep.subr.bf16.mxu1 %v950_v11  ;;  %v965_v26 = vld [vmem:[%s1243_s1 + $0x30] sm:$0xff]   ;;  %v969_v30 = vld [vmem:[%s1243_s1 + $0x38] sm:$0xff]   ;;  %564 = vmatprep.mubr.bf16.mxu0 %v973_v33  ;;  %v975_v35 = vld [vmem:[%s1243_s1 + $0x140] sm:$0xff]  }
   0xb   :  { %846 = vmatpush3.bf16.msra.mxu0 %v949_v10  ;;  %v966_v27 = vld [vmem:[%s1243_s1 + $0xf0] sm:$0xff]   ;;  %v970_v31 = vld [vmem:[%s1243_s1 + $0xf8] sm:$0xff]   ;;  %v976_v36 = vld [vmem:[%s1244_s0 + $0x8] ss:$28 sps:$4 sm:$0xff]  }
   0xc   :  { %847 = vmatprep.subr.bf16.mxu0 %v952_v13  ;;  %v967_v28 = vld [vmem:[%s1243_s1 + $0xb0] sm:$0xff]   ;;  %v971_v32 = vld [vmem:[%s1244_s0] ss:$28 sps:$4 sm:$0xff]   ;;  %v978_v37 = vld [vmem:[%s1244_s0 + $0xc] ss:$28 sps:$4 sm:$0xff]  }
   0xd   :  { %874 = vmatpush3.bf16.msra.mxu1 %v951_v12  ;;  %v974_v34 = vld [vmem:[%s1243_s1 + $0xb8] sm:$0xff]   ;;  %v979_v38 = vld [vmem:[%s1243_s1 + $0x100] sm:$0xff]   ;;  %613 = vmatprep.mubr.bf16.mxu1 %v978_v37  ;;  %v980_v39 = vld [vmem:[%s1243_s1 + $0x148] sm:$0xff]  }
   0xe   :  { %875 = vmatprep.subr.bf16.mxu1 %v954_v15  ;;  %v981_v40 = vld [vmem:[%s1243_s1 + $0x108] sm:$0xff]   ;;  %v982_v41 = vld [vmem:[%s1243_s1 + $0x150] sm:$0xff]   ;;  %v984_v43 = vld [vmem:[%s1243_s1 + $0x158] sm:$0xff]  }
   0xf   :  { %848 = vmatpush3.bf16.msra.mxu0 %v953_v14  ;;  %v983_v42 = vld [vmem:[%s1243_s1 + $0x110] sm:$0xff]   ;;  %v988_v44 = vld [vmem:[%s1244_s0 + $0x3c] ss:$28 sps:$4 sm:$0xff]   ;;  %v986_v47 = vld [vmem:[%s1243_s1 + $0x160] sm:$0xff]  }
  0x10   :  { %849 = vmatprep.subr.bf16.mxu0 %v956_v17  ;;  %v985_v45 = vld [vmem:[%s1243_s1 + $0x118] sm:$0xff]   ;;  %v993_v48 = vld [vmem:[%s1244_s0 + $0x44] ss:$28 sps:$4 sm:$0xff]   ;;  %v990_v51 = vld [vmem:[%s1243_s1 + $0x168] sm:$0xff]  }
  0x11   :  { %876 = vmatpush3.bf16.msra.mxu1 %v955_v16  ;;  %v991_v46 = vld [vmem:[%s1244_s0 + $0x38] ss:$28 sps:$4 sm:$0xff]   ;;  %v995_v49 = vld [vmem:[%s1244_s0 + $0x40] ss:$28 sps:$4 sm:$0xff]   ;;  %v992_v53 = vld [vmem:[%s1243_s1 + $0x128] sm:$0xff]  }
  0x12   :  { %877 = vmatprep.subr.bf16.mxu1 %v958_v19  ;;  %v987_v50 = vld [vmem:[%s1243_s1 + $0x120] sm:$0xff]   ;;  %v996_v54 = vld [vmem:[%s1243_s1 + $0x170] sm:$0xff]   ;;  %v1004_v57 = vld [vmem:[%s1243_s1 + $0x188] sm:$0xff]  }
  0x13   :  { %850 = vmatpush3.bf16.msra.mxu0 %v957_v18  ;;  %v998_v52 = vld [vmem:[%s1243_s1 + $0x180] sm:$0xff]   ;;  %v1003_v55 = vld [vmem:[%s1244_s0 + $0x14] ss:$28 sps:$4 sm:$0xff]   ;;  %v999_v60 = vld [vmem:[%s1243_s1 + $0x178] sm:$0xff]  }
  0x14   :  { %851 = vmatprep.subr.bf16.mxu0 %v960_v21  ;;  %v997_v56 = vld [vmem:[%s1243_s1 + $0x130] sm:$0xff]   ;;  %v131_v61 = vld [vmem:[%s1245_s2] sm:$0xff]  ;;  %v1000_v63 = vld [vmem:[%s1243_s1 + $0x138] sm:$0xff]  }
  0x15   :  { %878 = vmatpush3.bf16.msra.mxu1 %v959_v20  ;;  %v1005_v58 = vld [vmem:[%s1244_s0 + $0x18] ss:$28 sps:$4 sm:$0xff]   ;;  %v1006_v59 = vld [vmem:[%s1244_s0 + $0x50] ss:$28 sps:$4 sm:$0xff]   ;;  %137 = vperm.xlu0 %938, %v131_v61   ;;  %v1009_v4 = vld [vmem:[%s1244_s0 + $0x48] ss:$28 sps:$4 sm:$0xff]  }
  0x16   :  { %879 = vmatprep.subr.bf16.mxu1 %v962_v23  ;;  %v133_v62 = vld [vmem:[%s1245_s2 + $0x10] sm:$0xff]  ;;  %v132_v0 = vld [vmem:[%s1245_s2 + $0x8] sm:$0xff]  ;;  %v134_v1 = vld [vmem:[%s1245_s2 + $0x18] sm:$0xff] }
  0x17   :  { %852 = vmatpush3.bf16.msra.mxu0 %v961_v22  ;;  %147 = vperm.xlu1 %939, %v133_v62   ;;  %v1001_v2 = vld [vmem:[%s1244_s0 + $0x10] ss:$28 sps:$4 sm:$0xff]  }
  0x18   :  { %853 = vmatprep.subr.bf16.mxu0 %v964_v25  ;;  %v1007_v3 = vld [vmem:[%s1244_s0 + $0x4c] ss:$28 sps:$4 sm:$0xff]  }
  0x19   :  { %880 = vmatpush3.bf16.msra.mxu1 %v963_v24  ;;  %142 = vperm.xlu0 %938, %v132_v0  }
  0x1a   :  { %881 = vmatprep.subr.bf16.mxu1 %v966_v27 }
  0x1b   :  { %854 = vmatpush3.bf16.msra.mxu0 %v965_v26  ;;  %152 = vperm.xlu1 %939, %v134_v1  }
  0x1c   :  { %855 = vmatprep.subr.bf16.mxu0 %v968_v29 }
  0x1d   :  { %882 = vmatpush3.bf16.msra.mxu1 %v967_v28 }
  0x1e   :  { %883 = vmatprep.subr.bf16.mxu1 %v970_v31 }
  0x1f   :  { %856 = vmatpush3.bf16.msra.mxu0 %v969_v30 }
  0x20   :  { %897 = vmatprep.subr.bf16.mxu0 %v975_v35 }
  0x21   :  { %884 = vmatpush3.bf16.msra.mxu1 %v974_v34 }
  0x22   :  { %565 = vmatmul.mubr.bf16.vlgmr.msra.gmra.mrb[0].mxu0 %v971_v32  ;;  %929 = vmatprep.subr.bf16.mxu1 %v998_v52 }
  0x23   :  { %898 = vmatpush3.bf16.msra.mxu0 %v979_v38  ;;  %572 = vmatprep.mubr.bf16.mxu0 %v988_v44 }
  0x24   :  { %614 = vmatmul.mubr.bf16.vlgmr.msra.gmra.mrb[0].mxu1 %v976_v36  ;;  %899 = vmatprep.subr.bf16.mxu0 %v980_v39 }
  0x25   :  { %621 = vmatprep.mubr.bf16.mxu1 %v993_v48  ;;  %930 = vmatpush3.bf16.msra.mxu1 %v998_v52 }
  0x26   :  { %931 = vmatprep.subr.bf16.mxu1 %v1004_v57 }
  0x27   :  { %900 = vmatpush3.bf16.msra.mxu0 %v981_v40 }
  0x28   :  { %901 = vmatprep.subr.bf16.mxu0 %v982_v41 }
  0x29   :  { %932 = vmatpush3.bf16.msra.mxu1 %v1004_v57 }
  0x2a   :  { %573 = vmatmul.mubr.bf16.gmra.mrb[4].mxu0 %v991_v46 }
  0x2b   :  { %902 = vmatpush3.bf16.msra.mxu0 %v983_v42  ;;  %662 = vmatprep.mubr.bf16.mxu0 %v1003_v55 }
  0x2c   :  { %903 = vmatprep.subr.bf16.mxu0 %v984_v43  ;;  %622 = vmatmul.mubr.bf16.gmra.mrb[4].mxu1 %v995_v49 }
  0x2d   :  { %933 = vmatprep.mubr.msk.bf16.mxu1 %vm525_vm0, %v1005_v58 }
  0x2f   :  { %904 = vmatpush3.bf16.msra.mxu0 %v985_v45 }
  0x30   :  { %905 = vmatprep.subr.bf16.mxu0 %v986_v47 }
  0x33   :  { %906 = vmatpush3.bf16.msra.mxu0 %v987_v50 }
  0x34   :  { %907 = vmatprep.subr.bf16.mxu0 %v990_v51  ;;  %934 = vmatmul.mubr.msk.bf16.vlgmr.msra.gmra.mrb[8].mxu1 %vm525_vm0, %v1006_v59 }
  0x37   :  { %908 = vmatpush3.bf16.msra.mxu0 %v992_v53 }
  0x38   :  { %909 = vmatprep.subr.bf16.mxu0 %v996_v54 }
  0x3b   :  { %910 = vmatpush3.bf16.msra.mxu0 %v997_v56 }
  0x3c   :  { %911 = vmatprep.subr.bf16.mxu0 %v999_v60 }
  0x3f   :  { %912 = vmatpush3.bf16.msra.mxu0 %v1000_v63 }
  0x42   :  { %663 = vmatmul.mubr.bf16.vlgmr.msra.gmra.mrb[8].mxu0 %v1001_v2 }
  0x43   :  { %670 = vmatprep.mubr.bf16.mxu0 %v1007_v3 }
  0x4a   :  { %671 = vmatmul.mubr.bf16.gmra.mrb[12].mxu0 %v1009_v4 }
  0x94   :  { %v138_v5 = vpop.permute.xlu0 %137 }
  0x96   :  { %v148_v23 = vpop.permute.xlu1 %147 }
  0x98   :  { %v143_v10 = vpop.permute.xlu0 %142 }
  0x9a   :  { %v153_v28 = vpop.permute.xlu1 %152 }
  0xf5   :  { %v857_v6 = vpop.f32.mrb[0].mxu0 }
  0xf6   :  { %v858_v7 = vpop.f32.mrb[1].mxu0 }
  0xf7   :  { %v859_v8 = vadd.f32 %v858_v7, %v857_v6  ;;  %v860_v9 = vpop.f32.mrb[2].mxu0  ;;  %v885_v11 = vpop.f32.mrb[0].mxu1 }
  0xf8   :  { %v861_v12 = vpop.f32.mrb[3].mxu0  ;;  %v886_v15 = vpop.f32.mrb[1].mxu1 }
  0xf9   :  { %v567_v13 = vadd.f32 %v859_v8, %v138_v5  ;;  %v862_v14 = vadd.f32 %v861_v12, %v860_v9  ;;  %v887_v16 = vadd.f32 %v886_v15, %v885_v11  ;;  %v888_v17 = vpop.f32.mrb[2].mxu1 }
  0xfa   :  { %v889_v19 = vpop.f32.mrb[3].mxu1 }
  0xfb   :  { %v570_v18 = vadd.f32 %v862_v14, %v143_v10  ;;  %v616_v20 = vadd.f32 %v887_v16, %v567_v13  ;;  %v890_v21 = vadd.f32 %v889_v19, %v888_v17 }
  0xfd   :  { %v619_v22 = vadd.f32 %v890_v21, %v570_v18  ;;  %v863_v24 = vpop.f32.mrb[4].mxu0 }
  0xfe   :  { %v864_v25 = vpop.f32.mrb[5].mxu0 }
  0xff   :  { %v865_v26 = vadd.f32 %v864_v25, %v863_v24  ;;  %v866_v27 = vpop.f32.mrb[6].mxu0  ;;  %v891_v29 = vpop.f32.mrb[4].mxu1 }
 0x100   :  { %v867_v30 = vpop.f32.mrb[7].mxu0  ;;  %v892_v33 = vpop.f32.mrb[5].mxu1 }
 0x101   :  { %v575_v31 = vadd.f32 %v865_v26, %v148_v23  ;;  %v868_v32 = vadd.f32 %v867_v30, %v866_v27  ;;  %v893_v34 = vadd.f32 %v892_v33, %v891_v29  ;;  %v894_v35 = vpop.f32.mrb[6].mxu1 }
 0x102   :  { %v895_v37 = vpop.f32.mrb[7].mxu1 }
 0x103   :  { %v578_v36 = vadd.f32 %v868_v32, %v153_v28  ;;  %v624_v38 = vadd.f32 %v893_v34, %v575_v31  ;;  %v896_v39 = vadd.f32 %v895_v37, %v894_v35 }
 0x105   :  { %v627_v40 = vadd.f32 %v896_v39, %v578_v36 }
 0x107   :  { %v935_v41 = vpop.f32.mrb[8].mxu1 }
 0x108   :  { %v713_v42 = vpop.f32.mrb[9].mxu1 }
 0x109   :  { %v936_v43 = vpop.f32.mrb[10].mxu1 }
 0x10a   :  { %v716_v44 = vpop.f32.mrb[11].mxu1 }
 0x115   :  { %v913_v45 = vpop.f32.mrb[8].mxu0 }
 0x116   :  { %v914_v46 = vpop.f32.mrb[9].mxu0 }
 0x117   :  { %v915_v47 = vadd.f32 %v914_v46, %v913_v45  ;;  %v916_v48 = vpop.f32.mrb[10].mxu0 }
 0x118   :  { %v917_v49 = vpop.f32.mrb[11].mxu0 }
 0x119   :  { %v918_v50 = vadd.f32 %v917_v49, %v916_v48  ;;  %v665_v51 = vadd.f32 %v915_v47, %v616_v20 }
 0x11b   :  { %v714_v52 = vadd.f32 %v713_v42, %v665_v51  ;;  %v668_v53 = vadd.f32 %v918_v50, %v619_v22 }
 0x11d   :  { %v717_v54 = vadd.f32 %v716_v44, %v668_v53  ;;  %v919_v55 = vpop.f32.mrb[12].mxu0  ;;  %v728_v57 = vmax.f32 %v714_v52, 0.0 }
 0x11e   :  { %v920_v56 = vpop.f32.mrb[13].mxu0 }
 0x11f   :  { %v729_v58 = vmax.f32 %v717_v54, 0.0  ;;  %v921_v59 = vadd.f32 %v920_v56, %v919_v55  ;;  %v922_v60 = vpop.f32.mrb[14].mxu0 }
 0x120   :  { %v923_v61 = vpop.f32.mrb[15].mxu0 }
 0x121   :  { %v833_v62 = vpack.c.bf16 %v729_v58, %v728_v57  ;;  %v673_v63 = vadd.f32 %v921_v59, %v624_v38  ;;  %v924_v0 = vadd.f32 %v923_v61, %v922_v60 }
 0x123   :  { %834 = vst [vmem:[%s1246_s3] sm:$0xff] %v833_v62   ;;  %v722_v1 = vadd.f32 %v935_v41, %v673_v63  ;;  %v676_v2 = vadd.f32 %v924_v0, %v627_v40 }
 0x125   :  { %v725_v3 = vadd.f32 %v936_v43, %v676_v2  ;;  %v730_v4 = vmax.f32 %v722_v1, 0.0 }
 0x127   :  { %v731_v5 = vmax.f32 %v725_v3, 0.0 }
 0x129   :  { %v838_v6 = vpack.c.bf16 %v731_v5, %v730_v4 }
 0x12b   :  { %840 = vst [vmem:[%s1246_s3 + $0x8] sm:$0xff] %v838_v6  }

// kernel: single_q_forward.8
= control target key start
LH: loop header
LB: loop body
LE: loop exit
PB: predicated region body
PF: predicated region fallthrough
CT: control target
= control target key end

     0   :  { %v912_v40 = vmov 0.0   ;;  %vm913_vm0 = vmmov 0   ;;  %s1120_s1 = inlined_call_operand.vmem [shape: bf16[896,128], index: 1, kind: input, shape index: {}]   ;;  %s1121_s0 = inlined_call_operand.vmem [shape: bf16[8,896], index: 0, kind: input, shape index: {}]   ;;  %s1122_s2 = inlined_call_operand.vmem [shape: f32[1,128], index: 2, kind: input, shape index: {}]   ;;  %s1123_s3 = inlined_call_operand.vmem [shape: f32[8,128], index: 3, kind: output, shape index: {}]  }
   0x1   :  { %v845_v0 = vld [vmem:[%s1120_s1 + $0x40] sm:$0xff]   ;;  %v849_v4 = vld [vmem:[%s1120_s1 + $0x48] sm:$0xff]   ;;  %v853_v8 = vld [vmem:[%s1120_s1 + $0x50] sm:$0xff]  }
   0x2   :  { %v846_v1 = vld [vmem:[%s1120_s1 + $0xc0] sm:$0xff]   ;;  %748 = vmatprep.subr.bf16.mxu0 %v845_v0  ;;  %v850_v5 = vld [vmem:[%s1120_s1 + $0xc8] sm:$0xff]   ;;  %v854_v9 = vld [vmem:[%s1120_s1 + $0xd0] sm:$0xff]  }
   0x3   :  { %v847_v2 = vld [vmem:[%s1120_s1] sm:$0xff]   ;;  %770 = vmatprep.subr.bf16.mxu1 %v846_v1  ;;  %v851_v6 = vld [vmem:[%s1120_s1 + $0x8] sm:$0xff]   ;;  %v855_v10 = vld [vmem:[%s1120_s1 + $0x10] sm:$0xff]  }
   0x4   :  { %v848_v3 = vld [vmem:[%s1120_s1 + $0x80] sm:$0xff]   ;;  %749 = vmatpush3.bf16.msra.mxu0 %v847_v2  ;;  %v852_v7 = vld [vmem:[%s1120_s1 + $0x88] sm:$0xff]   ;;  %v856_v11 = vld [vmem:[%s1120_s1 + $0x90] sm:$0xff]  }
   0x5   :  { %771 = vmatpush3.bf16.msra.mxu1 %v848_v3  ;;  %750 = vmatprep.subr.bf16.mxu0 %v849_v4  ;;  %v857_v12 = vld [vmem:[%s1120_s1 + $0x58] sm:$0xff]   ;;  %v861_v16 = vld [vmem:[%s1120_s1 + $0x60] sm:$0xff]   ;;  %v865_v20 = vld [vmem:[%s1120_s1 + $0x68] sm:$0xff]  }
   0x6   :  { %772 = vmatprep.subr.bf16.mxu1 %v850_v5  ;;  %v858_v13 = vld [vmem:[%s1120_s1 + $0xd8] sm:$0xff]   ;;  %v862_v17 = vld [vmem:[%s1120_s1 + $0xe0] sm:$0xff]   ;;  %v866_v21 = vld [vmem:[%s1120_s1 + $0xe8] sm:$0xff]  }
   0x7   :  { %v859_v14 = vld [vmem:[%s1120_s1 + $0x18] sm:$0xff]   ;;  %v863_v18 = vld [vmem:[%s1120_s1 + $0x20] sm:$0xff]   ;;  %v867_v22 = vld [vmem:[%s1120_s1 + $0x28] sm:$0xff]  }
   0x8   :  { %751 = vmatpush3.bf16.msra.mxu0 %v851_v6  ;;  %v860_v15 = vld [vmem:[%s1120_s1 + $0x98] sm:$0xff]   ;;  %v864_v19 = vld [vmem:[%s1120_s1 + $0xa0] sm:$0xff]   ;;  %v868_v23 = vld [vmem:[%s1120_s1 + $0xa8] sm:$0xff]  }
   0x9   :  { %773 = vmatpush3.bf16.msra.mxu1 %v852_v7  ;;  %752 = vmatprep.subr.bf16.mxu0 %v853_v8  ;;  %v869_v24 = vld [vmem:[%s1120_s1 + $0x70] sm:$0xff]   ;;  %v873_v28 = vld [vmem:[%s1120_s1 + $0x78] sm:$0xff]   ;;  %v21_v32 = vld [vmem:[%s1121_s0] sm:$0xff] }
   0xa   :  { %774 = vmatprep.subr.bf16.mxu1 %v854_v9  ;;  %v870_v25 = vld [vmem:[%s1120_s1 + $0xf0] sm:$0xff]   ;;  %v874_v29 = vld [vmem:[%s1120_s1 + $0xf8] sm:$0xff]   ;;  %v22_v33 = vld [vmem:[%s1121_s0 + $0x8] sm:$0xff]  ;;  %v684_v34 = vcombine.low %v21_v32, %v21_v32  ;;  %v685_v35 = vcombine.high %v21_v32, %v21_v32 }
   0xb   :  { %v871_v26 = vld [vmem:[%s1120_s1 + $0x30] sm:$0xff]   ;;  %v875_v30 = vld [vmem:[%s1120_s1 + $0x38] sm:$0xff]   ;;  %v686_v36 = vcombine.low %v22_v33, %v22_v33  ;;  %v687_v37 = vcombine.high %v22_v33, %v22_v33  ;;  %v881_v38 = vld [vmem:[%s1120_s1 + $0x140] sm:$0xff]  }
   0xc   :  { %753 = vmatpush3.bf16.msra.mxu0 %v855_v10  ;;  %v872_v27 = vld [vmem:[%s1120_s1 + $0xb0] sm:$0xff]   ;;  %v876_v31 = vld [vmem:[%s1120_s1 + $0xb8] sm:$0xff]   ;;  %v882_v39 = vld [vmem:[%s1120_s1 + $0x100] sm:$0xff]   ;;  %530 = vmatprep.mubr.bf16.mxu0 %v685_v35 }
   0xd   :  { %775 = vmatpush3.bf16.msra.mxu1 %v856_v11  ;;  %754 = vmatprep.subr.bf16.mxu0 %v857_v12  ;;  %v883_v41 = vld [vmem:[%s1120_s1 + $0x180] sm:$0xff]   ;;  %v884_v42 = vld [vmem:[%s1120_s1 + $0x148] sm:$0xff]   ;;  %v887_v45 = vld [vmem:[%s1120_s1 + $0x150] sm:$0xff]  }
   0xe   :  { %776 = vmatprep.subr.bf16.mxu1 %v858_v13  ;;  %570 = vmatprep.mubr.bf16.mxu1 %v687_v37  ;;  %v885_v43 = vld [vmem:[%s1120_s1 + $0x108] sm:$0xff]   ;;  %v889_v46 = vld [vmem:[%s1120_s1 + $0x190] sm:$0xff]   ;;  %v890_v48 = vld [vmem:[%s1120_s1 + $0x158] sm:$0xff]  }
   0xf   :  { %v886_v44 = vld [vmem:[%s1120_s1 + $0x188] sm:$0xff]   ;;  %v888_v47 = vld [vmem:[%s1120_s1 + $0x110] sm:$0xff]   ;;  %v892_v49 = vld [vmem:[%s1120_s1 + $0x198] sm:$0xff]  }
  0x10   :  { %755 = vmatpush3.bf16.msra.mxu0 %v859_v14  ;;  %v891_v50 = vld [vmem:[%s1120_s1 + $0x118] sm:$0xff]   ;;  %v893_v51 = vld [vmem:[%s1120_s1 + $0x160] sm:$0xff]   ;;  %v896_v54 = vld [vmem:[%s1120_s1 + $0x168] sm:$0xff]  }
  0x11   :  { %777 = vmatpush3.bf16.msra.mxu1 %v860_v15  ;;  %756 = vmatprep.subr.bf16.mxu0 %v861_v16  ;;  %v895_v52 = vld [vmem:[%s1120_s1 + $0x1a0] sm:$0xff]   ;;  %v898_v55 = vld [vmem:[%s1120_s1 + $0x1a8] sm:$0xff]   ;;  %v899_v57 = vld [vmem:[%s1120_s1 + $0x170] sm:$0xff]  }
  0x12   :  { %778 = vmatprep.subr.bf16.mxu1 %v862_v17  ;;  %v894_v53 = vld [vmem:[%s1120_s1 + $0x120] sm:$0xff]   ;;  %v897_v56 = vld [vmem:[%s1120_s1 + $0x128] sm:$0xff]   ;;  %v23_v58 = vld [vmem:[%s1121_s0 + $0x10] sm:$0xff] }
  0x13   :  { %v689_v59 = vcombine.high %v23_v58, %v23_v58  ;;  %v901_v60 = vld [vmem:[%s1120_s1 + $0x1b0] sm:$0xff]   ;;  %v902_v62 = vld [vmem:[%s1120_s1 + $0x178] sm:$0xff]   ;;  %v688_v2 = vcombine.low %v23_v58, %v23_v58 }
  0x14   :  { %757 = vmatpush3.bf16.msra.mxu0 %v863_v18  ;;  %v900_v61 = vld [vmem:[%s1120_s1 + $0x130] sm:$0xff]   ;;  %v906_v63 = vld [vmem:[%s1120_s1 + $0x1b8] sm:$0xff]  }
  0x15   :  { %779 = vmatpush3.bf16.msra.mxu1 %v864_v19  ;;  %758 = vmatprep.subr.bf16.mxu0 %v865_v20  ;;  %v903_v0 = vld [vmem:[%s1120_s1 + $0x138] sm:$0xff]  }
  0x16   :  { %780 = vmatprep.subr.bf16.mxu1 %v866_v21  ;;  %v907_v1 = vld [vmem:[%s1121_s0 + $0x18] ss:$0 sps:$4 sm:$0xff]  }
  0x18   :  { %759 = vmatpush3.bf16.msra.mxu0 %v867_v22 }
  0x19   :  { %781 = vmatpush3.bf16.msra.mxu1 %v868_v23  ;;  %760 = vmatprep.subr.bf16.mxu0 %v869_v24  ;;  %v747_v24 = vld [vmem:[%s1122_s2] ss:$0 sm:$0xff] }
  0x1a   :  { %782 = vmatprep.subr.bf16.mxu1 %v870_v25 }
  0x1c   :  { %761 = vmatpush3.bf16.msra.mxu0 %v871_v26 }
  0x1d   :  { %783 = vmatpush3.bf16.msra.mxu1 %v872_v27  ;;  %762 = vmatprep.subr.bf16.mxu0 %v873_v28 }
  0x1e   :  { %784 = vmatprep.subr.bf16.mxu1 %v874_v29 }
  0x20   :  { %763 = vmatpush3.bf16.msra.mxu0 %v875_v30 }
  0x21   :  { %785 = vmatpush3.bf16.msra.mxu1 %v876_v31  ;;  %792 = vmatprep.subr.bf16.mxu0 %v881_v38 }
  0x22   :  { %823 = vmatprep.subr.bf16.mxu1 %v912_v40 }
  0x23   :  { %531 = vmatmul.mubr.bf16.vlgmr.msra.gmra.mrb[0].mxu0 %v684_v34 }
  0x24   :  { %571 = vmatmul.mubr.bf16.vlgmr.msra.gmra.mrb[0].mxu1 %v686_v36  ;;  %793 = vmatpush3.bf16.msra.mxu0 %v882_v39 }
  0x25   :  { %824 = vmatpush3.bf16.msra.mxu1 %v883_v41  ;;  %794 = vmatprep.subr.bf16.mxu0 %v884_v42 }
  0x26   :  { %825 = vmatprep.subr.bf16.mxu1 %v912_v40  ;;  %839 = vmatprep.mubr.msk.bf16.mxu1 %vm913_vm0, %v912_v40 }
  0x27   :  { %610 = vmatprep.mubr.bf16.mxu0 %v689_v59 }
  0x28   :  { %795 = vmatpush3.bf16.msra.mxu0 %v885_v43 }
  0x29   :  { %826 = vmatpush3.bf16.msra.mxu1 %v886_v44  ;;  %796 = vmatprep.subr.bf16.mxu0 %v887_v45 }
  0x2a   :  { %827 = vmatprep.subr.bf16.mxu1 %v912_v40 }
  0x2c   :  { %797 = vmatpush3.bf16.msra.mxu0 %v888_v47 }
  0x2d   :  { %828 = vmatpush3.bf16.msra.mxu1 %v889_v46  ;;  %798 = vmatprep.subr.bf16.mxu0 %v890_v48 }
  0x2e   :  { %829 = vmatprep.subr.bf16.mxu1 %v912_v40 }
  0x30   :  { %799 = vmatpush3.bf16.msra.mxu0 %v891_v50 }
  0x31   :  { %830 = vmatpush3.bf16.msra.mxu1 %v892_v49  ;;  %800 = vmatprep.subr.bf16.mxu0 %v893_v51 }
  0x32   :  { %831 = vmatprep.subr.bf16.mxu1 %v912_v40 }
  0x34   :  { %801 = vmatpush3.bf16.msra.mxu0 %v894_v53 }
  0x35   :  { %832 = vmatpush3.bf16.msra.mxu1 %v895_v52  ;;  %802 = vmatprep.subr.bf16.mxu0 %v896_v54 }
  0x36   :  { %833 = vmatprep.subr.bf16.mxu1 %v912_v40 }
  0x38   :  { %803 = vmatpush3.bf16.msra.mxu0 %v897_v56 }
  0x39   :  { %834 = vmatpush3.bf16.msra.mxu1 %v898_v55  ;;  %804 = vmatprep.subr.bf16.mxu0 %v899_v57 }
  0x3a   :  { %835 = vmatprep.subr.bf16.mxu1 %v912_v40 }
  0x3c   :  { %805 = vmatpush3.bf16.msra.mxu0 %v900_v61 }
  0x3d   :  { %836 = vmatpush3.bf16.msra.mxu1 %v901_v60  ;;  %806 = vmatprep.subr.bf16.mxu0 %v902_v62 }
  0x3e   :  { %837 = vmatprep.subr.bf16.mxu1 %v912_v40 }
  0x40   :  { %807 = vmatpush3.bf16.msra.mxu0 %v903_v0 }
  0x41   :  { %838 = vmatpush3.bf16.msra.mxu1 %v906_v63 }
  0x43   :  { %611 = vmatmul.mubr.bf16.vlgmr.msra.gmra.mrb[4].mxu0 %v688_v2 }
  0x44   :  { %840 = vmatmul.mubr.bf16.vlgmr.msra.gmra.mrb[4].mxu1 %v907_v1 }
  0xf6   :  { %v764_v3 = vpop.f32.mrb[0].mxu0 }
  0xf7   :  { %v786_v4 = vpop.f32.mrb[0].mxu1  ;;  %v765_v5 = vpop.f32.mrb[1].mxu0 }
  0xf8   :  { %v787_v6 = vpop.f32.mrb[1].mxu1  ;;  %v766_v7 = vadd.f32 %v765_v5, %v764_v3  ;;  %v767_v9 = vpop.f32.mrb[2].mxu0 }
  0xf9   :  { %v788_v8 = vadd.f32 %v787_v6, %v786_v4  ;;  %v789_v10 = vpop.f32.mrb[2].mxu1  ;;  %v768_v11 = vpop.f32.mrb[3].mxu0 }
  0xfa   :  { %v790_v12 = vpop.f32.mrb[3].mxu1 }
  0xfb   :  { %v573_v13 = vadd.f32 %v788_v8, %v766_v7 }
 0x116   :  { %v808_v15 = vpop.f32.mrb[4].mxu0 }
 0x117   :  { %v652_v14 = vpop.f32.mrb[4].mxu1  ;;  %v809_v17 = vpop.f32.mrb[5].mxu0 }
 0x118   :  { %v841_v16 = vpop.f32.mrb[5].mxu1  ;;  %v810_v19 = vadd.f32 %v809_v17, %v808_v15  ;;  %v811_v20 = vpop.f32.mrb[6].mxu0 }
 0x119   :  { %v655_v18 = vpop.f32.mrb[6].mxu1  ;;  %v812_v22 = vpop.f32.mrb[7].mxu0 }
 0x11a   :  { %v842_v21 = vpop.f32.mrb[7].mxu1  ;;  %v613_v23 = vadd.f32 %v810_v19, %v573_v13 }
 0x11c   :  { %v653_v25 = vadd.f32 %v652_v14, %v613_v23 }
 0x11e   :  { %v671_v26 = vadd.f32 %v747_v24, %v653_v25 }
 0x120   :  { %v672_v27 = vsub.f32 0.0, %v671_v26 }
 0x122   :  { %v673_v28 = vmul.f32 1.442695, %v672_v27 }
 0x124   :  { %908 = vpow2.f32 %v673_v28 }
 0x12e   :  { %v909_v29 = vpop.eup %908 }
 0x12f   :  { %v675_v30 = vadd.f32 1.0, %v909_v29 }
 0x131   :  { %910 = vrcp.f32 %v675_v30 }
 0x13b   :  { %v911_v31 = vpop.eup %910 }
 0x13c   :  { %v678_v32 = vmul.f32 %v911_v31, %v671_v26 }
 0x13e   :  { %679 = vst [vmem:[%s1123_s3] sm:$0xff] %v678_v32 }

// kernel: single_q_forward.9
= control target key start
LH: loop header
LB: loop body
LE: loop exit
PB: predicated region body
PF: predicated region fallthrough
CT: control target
= control target key end

     0   :  { %v375_v0 = vmov 0.0|0.0   ;;  %vm376_vm0 = vmmov 0   ;;  %v377_v4 = vmov 0.0   ;;  %s540_s1 = inlined_call_operand.vmem [shape: f32[128,128], index: 1, kind: input, shape index: {}]   ;;  %s541_s4 = inlined_call_operand.vmem [shape: f32[128,128], index: 4, kind: input, shape index: {}]   ;;  %s542_s0 = inlined_call_operand.vmem [shape: f32[8,128], index: 0, kind: input, shape index: {}]   ;;  %s543_s2 = inlined_call_operand.vmem [shape: f32[1,128], index: 2, kind: input, shape index: {}]   ;;  %s544_s3 = inlined_call_operand.vmem [shape: f32[8,128], index: 3, kind: input, shape index: {}]   ;;  %s545_s5 = inlined_call_operand.vmem [shape: f32[1,128], index: 5, kind: input, shape index: {}]   ;;  %s546_s6 = inlined_call_operand.vmem [shape: f32[8,128], index: 6, kind: output, shape index: {}]  }
   0x1   :  { %324 = vmatprep.subr.bf16.mxu0 %v375_v0  ;;  %v24_v1 = vld [vmem:[%s540_s1] sm:$0xff]  ;;  %v25_v2 = vld [vmem:[%s540_s1 + $0x8] sm:$0xff]  ;;  %v26_v3 = vld [vmem:[%s540_s1 + $0x10] sm:$0xff]  ;;  %286 = vmatprep.mubr.msk.f32.mxu0 %vm376_vm0, %v377_v4 }
   0x2   :  { %v325_v5 = vpack.c.bf16 %v25_v2, %v24_v1  ;;  %v27_v6 = vld [vmem:[%s540_s1 + $0x18] sm:$0xff]  ;;  %348 = vmatprep.subr.bf16.mxu1 %v375_v0  ;;  %321 = vmatprep.mubr.msk.f32.mxu1 %vm376_vm0, %v377_v4  ;;  %v28_v8 = vld [vmem:[%s540_s1 + $0x20] sm:$0xff]  ;;  %v29_v9 = vld [vmem:[%s540_s1 + $0x28] sm:$0xff] }
   0x3   :  { %v328_v7 = vpack.c.bf16 %v27_v6, %v26_v3  ;;  %v119_v10 = vld [vmem:[%s541_s4] sm:$0xff]  ;;  %v120_v11 = vld [vmem:[%s541_s4 + $0x8] sm:$0xff]  ;;  %v121_v12 = vld [vmem:[%s541_s4 + $0x10] sm:$0xff]  ;;  %v331_v14 = vpack.c.bf16 %v29_v9, %v28_v8 }
   0x4   :  { %326 = vmatpush3.bf16.msra.mxu0 %v325_v5  ;;  %v122_v13 = vld [vmem:[%s541_s4 + $0x18] sm:$0xff]  ;;  %v349_v15 = vpack.c.bf16 %v120_v11, %v119_v10  ;;  %v30_v16 = vld [vmem:[%s540_s1 + $0x30] sm:$0xff]  ;;  %v123_v19 = vld [vmem:[%s541_s4 + $0x20] sm:$0xff] }
   0x5   :  { %327 = vmatprep.subr.bf16.mxu0 %v375_v0  ;;  %v31_v17 = vld [vmem:[%s540_s1 + $0x38] sm:$0xff]  ;;  %v352_v18 = vpack.c.bf16 %v122_v13, %v121_v12  ;;  %v124_v20 = vld [vmem:[%s541_s4 + $0x28] sm:$0xff]  ;;  %v32_v22 = vld [vmem:[%s540_s1 + $0x40] sm:$0xff] }
   0x6   :  { %350 = vmatpush3.bf16.msra.mxu1 %v349_v15  ;;  %v334_v21 = vpack.c.bf16 %v31_v17, %v30_v16  ;;  %v33_v23 = vld [vmem:[%s540_s1 + $0x48] sm:$0xff]  ;;  %v355_v24 = vpack.c.bf16 %v124_v20, %v123_v19  ;;  %v125_v25 = vld [vmem:[%s541_s4 + $0x30] sm:$0xff]  ;;  %v126_v26 = vld [vmem:[%s541_s4 + $0x38] sm:$0xff] }
   0x7   :  { %351 = vmatprep.subr.bf16.mxu1 %v375_v0  ;;  %v337_v27 = vpack.c.bf16 %v33_v23, %v32_v22  ;;  %v34_v28 = vld [vmem:[%s540_s1 + $0x50] sm:$0xff]  ;;  %v35_v29 = vld [vmem:[%s540_s1 + $0x58] sm:$0xff]  ;;  %v358_v30 = vpack.c.bf16 %v126_v26, %v125_v25  ;;  %v127_v31 = vld [vmem:[%s541_s4 + $0x40] sm:$0xff] }
   0x8   :  { %329 = vmatpush3.bf16.msra.mxu0 %v328_v7  ;;  %v128_v32 = vld [vmem:[%s541_s4 + $0x48] sm:$0xff]  ;;  %v340_v33 = vpack.c.bf16 %v35_v29, %v34_v28  ;;  %v36_v34 = vld [vmem:[%s540_s1 + $0x60] sm:$0xff]  ;;  %v129_v37 = vld [vmem:[%s541_s4 + $0x50] sm:$0xff] }
   0x9   :  { %330 = vmatprep.subr.bf16.mxu0 %v375_v0  ;;  %v37_v35 = vld [vmem:[%s540_s1 + $0x68] sm:$0xff]  ;;  %v361_v36 = vpack.c.bf16 %v128_v32, %v127_v31  ;;  %v130_v38 = vld [vmem:[%s541_s4 + $0x58] sm:$0xff]  ;;  %v38_v40 = vld [vmem:[%s540_s1 + $0x70] sm:$0xff] }
   0xa   :  { %353 = vmatpush3.bf16.msra.mxu1 %v352_v18  ;;  %v343_v39 = vpack.c.bf16 %v37_v35, %v36_v34  ;;  %v39_v41 = vld [vmem:[%s540_s1 + $0x78] sm:$0xff]  ;;  %v364_v42 = vpack.c.bf16 %v130_v38, %v129_v37  ;;  %v131_v43 = vld [vmem:[%s541_s4 + $0x60] sm:$0xff]  ;;  %v132_v44 = vld [vmem:[%s541_s4 + $0x68] sm:$0xff] }
   0xb   :  { %354 = vmatprep.subr.bf16.mxu1 %v375_v0  ;;  %v346_v45 = vpack.c.bf16 %v39_v41, %v38_v40  ;;  %v367_v46 = vpack.c.bf16 %v132_v44, %v131_v43  ;;  %v23_v47 = vld [vmem:[%s542_s0] sm:$0xff]  ;;  %v133_v48 = vld [vmem:[%s541_s4 + $0x70] sm:$0xff]  ;;  %v134_v49 = vld [vmem:[%s541_s4 + $0x78] sm:$0xff] }
   0xc   :  { %332 = vmatpush3.bf16.msra.mxu0 %v331_v14  ;;  %v370_v50 = vpack.c.bf16 %v134_v49, %v133_v48  ;;  %v218_v51 = vld [vmem:[%s543_s2] ss:$0 sm:$0xff] }
   0xd   :  { %333 = vmatprep.subr.bf16.mxu0 %v375_v0  ;;  %v117_v53 = vld [vmem:[%s544_s3] sm:$0xff] }
   0xe   :  { %356 = vmatpush3.bf16.msra.mxu1 %v355_v24  ;;  %v219_v57 = vld [vmem:[%s545_s5] ss:$0 sm:$0xff] }
   0xf   :  { %357 = vmatprep.subr.bf16.mxu1 %v375_v0 }
  0x10   :  { %335 = vmatpush3.bf16.msra.mxu0 %v334_v21 }
  0x11   :  { %336 = vmatprep.subr.bf16.mxu0 %v375_v0 }
  0x12   :  { %359 = vmatpush3.bf16.msra.mxu1 %v358_v30 }
  0x13   :  { %360 = vmatprep.subr.bf16.mxu1 %v375_v0 }
  0x14   :  { %338 = vmatpush3.bf16.msra.mxu0 %v337_v27 }
  0x15   :  { %339 = vmatprep.subr.bf16.mxu0 %v375_v0 }
  0x16   :  { %362 = vmatpush3.bf16.msra.mxu1 %v361_v36 }
  0x17   :  { %363 = vmatprep.subr.bf16.mxu1 %v375_v0 }
  0x18   :  { %341 = vmatpush3.bf16.msra.mxu0 %v340_v33 }
  0x19   :  { %342 = vmatprep.subr.bf16.mxu0 %v375_v0 }
  0x1a   :  { %365 = vmatpush3.bf16.msra.mxu1 %v364_v42 }
  0x1b   :  { %366 = vmatprep.subr.bf16.mxu1 %v375_v0 }
  0x1c   :  { %344 = vmatpush3.bf16.msra.mxu0 %v343_v39 }
  0x1d   :  { %345 = vmatprep.subr.bf16.mxu0 %v375_v0 }
  0x1e   :  { %368 = vmatpush3.bf16.msra.mxu1 %v367_v46 }
  0x1f   :  { %369 = vmatprep.subr.bf16.mxu1 %v375_v0 }
  0x20   :  { %347 = vmatpush3.bf16.msra.mxu0 %v346_v45 }
  0x22   :  { %371 = vmatpush3.bf16.msra.mxu1 %v370_v50 }
  0x23   :  { %287 = vmatmul.mubr.f32.vlgmr.msra.gmra.mrb[0].mxu0 %v23_v47 }
  0xf6   :  { %v113_v52 = vpop.f32.mrb[0].mxu0 }
  0xf7   :  { %v114_v54 = vadd.f32 %v218_v51, %v113_v52  ;;  %v288_v55 = vpop.f32.mrb[1].mxu0 }
  0xf9   :  { %v118_v56 = vmul.f32 %v117_v53, %v114_v54 }
  0xfb   :  { %322 = vmatmul.mubr.f32.vlgmr.msra.gmra.mrb[0].mxu1 %v118_v56 }
 0x1ce   :  { %v208_v58 = vpop.f32.mrb[0].mxu1 }
 0x1cf   :  { %v209_v59 = vadd.f32 %v219_v57, %v208_v58  ;;  %v323_v60 = vpop.f32.mrb[1].mxu1 }
 0x1d1   :  { %v212_v61 = vmax.f32 %v209_v59, 0.0 }
 0x1d3   :  { %213 = vst [vmem:[%s546_s6] sm:$0xff] %v212_v61 }

</bundles_post_ra>
